<compile_context>
chip_gen: v5e
topology: v5e:2x2
jax: 0.10.0
libtpu: 0.0.40
codegen_flags: <defaults>
</compile_context>

<pallas_src>
import math

import jax
import jax.numpy as jnp
from jax.experimental import pallas as pl
from jax.experimental.pallas import tpu as pltpu


def _round_up(n, m):
    return ((n + m - 1) // m) * m


# ----------------------------------------------------------------------------
# Fused kernel: all LSTM layers + FC, no grid (whole problem resident in VMEM)
# ----------------------------------------------------------------------------
def _make_fused_kernel(num_layers, seq_len, hc, gate_w, batch_pad, t_chunk):
    """L layers of LSTM + FC.

    hc      : compute width of h/c and of each gate block
              (== H when packed, == round_up(H,128) otherwise)
    gate_w  : G = lane width of the gate buffers (128 if packed else 4*hc)
    """
    L, T, Hc, G, Bp, Tc = num_layers, seq_len, hc, gate_w, batch_pad, t_chunk
    packed = 4 * Hc <= 128
    # Full unroll only for short sequences; the (h,c) carry serializes the loop
    # anyway, so large T just bloats the instruction stream / vreg live ranges.
    unroll = True if T <= 16 else 4

    def kernel(*args):
        it = iter(args)
        gx0_ref = next(it)                                  # (T, Bp, G) f32
        whh_refs = [next(it) for _ in range(L)]             # (Hc, G) bf16
        wih_refs, b_refs = [], []
        for _ in range(L - 1):
            wih_refs.append(next(it))                       # (Hc, G) bf16
            b_refs.append(next(it))                         # (1, G)  f32
        wfc_ref = next(it)                                  # (Hc, Op) bf16
        bfc_ref = next(it)                                  # (1, Op)  f32
        o_ref = next(it)                                    # (Bp, Op) f32
        gates_ref = next(it)                                # scratch (Tc, Bp, G) f32
        hall_ref = next(it)                                 # scratch (T, Bp, Hc) bf16

        def cell(gates, h_prev, c_prev):
            # Gate layout: [ i | f | g | o ], each block Hc lanes wide.
            if packed:
                # One sigmoid + one tanh over the whole packed (Bp, G) vreg,
                # then slice out the gate blocks (lane work on the XLU; EUP
                # pushes drop from 5 to 3 per step).
                sig = jax.nn.sigmoid(gates)
                th = jnp.tanh(gates)
                i_g = sig[:, 0 * Hc:1 * Hc]
                f_g = sig[:, 1 * Hc:2 * Hc]
                g_g = th[:, 2 * Hc:3 * Hc]
                o_g = sig[:, 3 * Hc:4 * Hc]
            else:
                i_g = jax.nn.sigmoid(gates[:, 0 * Hc:1 * Hc])
                f_g = jax.nn.sigmoid(gates[:, 1 * Hc:2 * Hc])
                g_g = jnp.tanh(gates[:, 2 * Hc:3 * Hc])
                o_g = jax.nn.sigmoid(gates[:, 3 * Hc:4 * Hc])
            c_new = f_g * c_prev + i_g * g_g
            h_new = o_g * jnp.tanh(c_new)
            return h_new, c_new

        def recur(gsrc_ref, whh_ref, n_steps, t_base, carry, store_h):
            """Serial recurrence; gsrc_ref[t] holds the x-projection (+bias)."""
            # TODO(synk): keep W_hh resident across the layer with
            # pltpu.matmul_push_rhs / matmul_acc_lhs instead of re-reading
            # whh_ref from VMEM every step.
            def step(t, hc_carry):
                h_prev, c_prev = hc_carry
                gates = gsrc_ref[t] + jnp.dot(
                    h_prev.astype(jnp.bfloat16), whh_ref[...],
                    preferred_element_type=jnp.float32)      # (Bp, G) f32
                h_new, c_new = cell(gates, h_prev, c_prev)
                if store_h:                                  # only if a next
                    hall_ref[t_base + t] = h_new.astype(jnp.bfloat16)
                return h_new, c_new

            return jax.lax.fori_loop(0, n_steps, step, carry, unroll=unroll)

        zero_carry = (jnp.zeros((Bp, Hc), jnp.float32),      # h0 = 0
                      jnp.zeros((Bp, Hc), jnp.float32))      # c0 = 0

        # ---- layer 0: input gates precomputed by the wrapper (hoisted GEMM) -
        carry = recur(gx0_ref, whh_refs[0], T, 0, zero_carry, store_h=(L > 1))

        # ---- layers 1 .. L-1: chunked inter-layer projection + recurrence ---
        n_chunks = -(-T // Tc)
        for l in range(1, L):
            carry = zero_carry
            for c in range(n_chunks):
                t0 = c * Tc
                tc = min(Tc, T - t0)
                # Hoisted input projection for this chunk: ONE (tc*Bp, Hc) GEMM.
                # Cast to f32 before the reshape so the (tc, Bp, Hc)->(tc*Bp, Hc)
                # collapse is a layout no-op (Bp is a multiple of the f32
                # sublane tile); the dot operand is cast back to bf16.
                h_chunk = hall_ref[t0:t0 + tc].astype(jnp.float32)
                h_rows = h_chunk.reshape(tc * Bp, Hc).astype(jnp.bfloat16)
                g_seq = (jnp.dot(h_rows, wih_refs[l - 1][...],
                                 preferred_element_type=jnp.float32)
                         + b_refs[l - 1][...])
                gates_ref[0:tc] = g_seq.reshape(tc, Bp, G)
                carry = recur(gates_ref, whh_refs[l], tc, t0, carry,
                              store_h=(l < L - 1))

        # ---- FC on the last timestep of the top layer (logits[:, -1]) -------
        h_last = carry[0]
        o_ref[...] = (jnp.dot(h_last.astype(jnp.bfloat16), wfc_ref[...],
                              preferred_element_type=jnp.float32)
                      + bfc_ref[...])

    return kernel


# ----------------------------------------------------------------------------
# Wrapper
# ----------------------------------------------------------------------------
def lstm_sale_forward(x_btf, params, num_output):
    """Forward matching LSTMSale: stacked LSTM (h0=c0=0), FC on logits[:, -1]."""
    L = len(params["whh"])
    Hc, G = params["whh"][0].shape
    Op = params["fc_w"].shape[1]
    B, T, _ = x_btf.shape
    Bp = max(8, _round_up(B, 8))

    # Hoisted layer-0 input projection (bf16 MXU path, f32 accumulate), fused
    # with the batch_first -> time-major transpose, plus the folded f32 bias.
    gx0 = jnp.einsum("btf,gf->tbg", x_btf.astype(jnp.bfloat16), params["wih0"],
                     preferred_element_type=jnp.float32)
    gx0 = gx0 + params["bias0"]                               # (T, B, G) f32
    gx0 = jnp.pad(gx0, ((0, 0), (0, Bp - B), (0, 0)))         # pad batch -> sublanes
    # TODO(synk): for large T on v7x, keep gx0 in HBM (pl.ANY) and stream it in
    # Tc-sized chunks with make_async_copy instead of full VMEM residency.

    # Time-chunk for the inter-layer projection: keep the GEMM fed with >=256
    # rows per call while bounding the gates chunk buffer.
    Tc = min(T, max(1, -(-256 // Bp)))

    kernel = _make_fused_kernel(L, T, Hc, G, Bp, Tc)

    inputs = [gx0] + list(params["whh"])
    for l in range(L - 1):
        inputs += [params["wih_rest"][l], params["bias_rest"][l]]
    inputs += [params["fc_w"], params["fc_b"]]

    gates_rows = Tc if L > 1 else 1
    hall_rows = T if L > 1 else 1
    scratch_shapes = [
        pltpu.VMEM((gates_rows, Bp, G), jnp.float32),   # per-chunk gate buffer
        pltpu.VMEM((hall_rows, Bp, Hc), jnp.bfloat16),  # per-layer hidden seq
    ]

    # Scoped-VMEM limit sized to the actual resident set (with 2x headroom),
    # capped at 64 MiB so it is a legal limit on v7x as well as v5e/v6e.
    resident = sum(int(a.size) * a.dtype.itemsize for a in inputs)
    resident += Bp * Op * 4
    resident += gates_rows * Bp * G * 4 + hall_rows * Bp * Hc * 2
    vmem_limit = int(min(64 << 20, max(2 * resident, 8 << 20)))

    out_p = pl.pallas_call(
        kernel,
        out_shape=jax.ShapeDtypeStruct((Bp, Op), jnp.float32),
        in_specs=[pl.BlockSpec(memory_space=pltpu.MemorySpace.VMEM)] * len(inputs),
        out_specs=pl.BlockSpec(memory_space=pltpu.MemorySpace.VMEM),
        scratch_shapes=scratch_shapes,
        compiler_params=pltpu.CompilerParams(vmem_limit_bytes=vmem_limit),
    )(*inputs)

    return out_p[:B, :num_output]


# ----------------------------------------------------------------------------
# Parameter init (PyTorch-style uniform(-1/sqrt(H), 1/sqrt(H))), pre-padded /
# pre-transposed / gate-packed at init time so there is zero per-call layout
# work.  Gate g occupies columns/rows [g*Hc, g*Hc + H) of the G-wide gate axis.
# ----------------------------------------------------------------------------
def _place_cols_T(w, row_pad, Hc, H, G, dtype):
    """PyTorch (4H, in_dim) gate-blocked weight -> transposed (row_pad, G)."""
    _, in_dim = w.shape
    wt = w.T.astype(dtype)
    out = jnp.zeros((row_pad, G), dtype)
    for g in range(4):
        out = out.at[:in_dim, g * Hc:g * Hc + H].set(wt[:, g * H:(g + 1) * H])
    return out


def _place_rows(w, Hc, H, G, dtype):
    """PyTorch (4H, in_dim) -> (G, in_dim) with gate g rows at [g*Hc, g*Hc+H)."""
    _, in_dim = w.shape
    out = jnp.zeros((G, in_dim), dtype)
    for g in range(4):
        out = out.at[g * Hc:g * Hc + H, :].set(w[g * H:(g + 1) * H, :].astype(dtype))
    return out


def _place_bias(b, Hc, H, G):
    """(4H,) -> (1, G) with gate g at [g*Hc, g*Hc+H)."""
    out = jnp.zeros((1, G), jnp.float32)
    for g in range(4):
        out = out.at[0, g * Hc:g * Hc + H].set(b[g * H:(g + 1) * H])
    return out


def init_params(key, num_features, num_layers, hidden_dim, num_output):
    H = hidden_dim
    if 4 * H <= 128:                   # packed gate layout (one 128-lane vreg)
        Hc = H
        G = 128
    else:                              # per-gate 128-lane padding
        Hc = _round_up(H, 128)
        G = 4 * Hc
    Op = _round_up(num_output, 128)
    bound = 1.0 / math.sqrt(H)

    whh, wih_rest, bias_rest = [], [], []
    wih0 = bias0 = None
    for l in range(num_layers):
        in_dim = num_features if l == 0 else H
        key, k1, k2, k3, k4 = jax.random.split(key, 5)
        w_ih = jax.random.uniform(k1, (4 * H, in_dim), jnp.float32, -bound, bound)
        w_hh = jax.random.uniform(k2, (4 * H, H), jnp.float32, -bound, bound)
        b_ih = jax.random.uniform(k3, (4 * H,), jnp.float32, -bound, bound)
        b_hh = jax.random.uniform(k4, (4 * H,), jnp.float32, -bound, bound)
        whh.append(_place_cols_T(w_hh, Hc, Hc, H, G, jnp.bfloat16))
        if l == 0:
            wih0 = _place_rows(w_ih, Hc, H, G, jnp.bfloat16)        # (G, F) for wrapper GEMM
            bias0 = _place_bias(b_ih + b_hh, Hc, H, G)              # (1, G) f32
        else:
            wih_rest.append(_place_cols_T(w_ih, Hc, Hc, H, G, jnp.bfloat16))
            bias_rest.append(_place_bias(b_ih + b_hh, Hc, H, G))

    key, k5, k6 = jax.random.split(key, 3)
    w_fc = jax.random.uniform(k5, (num_output, H), jnp.float32, -bound, bound)
    b_fc = jax.random.uniform(k6, (num_output,), jnp.float32, -bound, bound)
    fc_w = jnp.zeros((Hc, Op), jnp.bfloat16).at[:H, :num_output].set(
        w_fc.T.astype(jnp.bfloat16))
    fc_b = jnp.zeros((1, Op), jnp.float32).at[0, :num_output].set(b_fc)

    return {
        "wih0": wih0, "bias0": bias0,
        "whh": whh, "wih_rest": wih_rest, "bias_rest": bias_rest,
        "fc_w": fc_w, "fc_b": fc_b,
    }


if __name__ == "__main__":
    B, T, F = 2, 8, 4          # batch, sequence length, num_features
    H, L, O = 32, 2, 1         # hidden dim, num_layers, num_output

    key = jax.random.PRNGKey(0)
    key, pkey, xkey = jax.random.split(key, 3)
    params = init_params(pkey, F, L, H, O)
    x = jax.random.normal(xkey, (B, T, F), dtype=jnp.float32)

    fwd = jax.jit(lstm_sale_forward, static_argnames=("num_output",))
    out = fwd(x, params, num_output=O)
    jax.block_until_ready(out)
    assert out.shape == (B, O) and out.dtype == jnp.float32
    # Note: weights/activations feed the MXU in bf16, so validation against the
    # f32 PyTorch reference needs a relaxed tolerance over long sequences.
    print("KERNEL_OK")
</pallas_src>

<mosaic_0001>
module attributes {stable_mosaic.version = 11 : i64} {
  func.func @kernel(%arg0: memref<8x8x128xf32, #tpu.memory_space<vmem>>, %arg1: memref<32x128xbf16, #tpu.memory_space<vmem>>, %arg2: memref<32x128xbf16, #tpu.memory_space<vmem>>, %arg3: memref<32x128xbf16, #tpu.memory_space<vmem>>, %arg4: memref<1x128xf32, #tpu.memory_space<vmem>>, %arg5: memref<32x128xbf16, #tpu.memory_space<vmem>>, %arg6: memref<1x128xf32, #tpu.memory_space<vmem>>, %arg7: memref<8x128xf32, #tpu.memory_space<vmem>>, %arg8: memref<8x8x128xf32, #tpu.memory_space<vmem>>, %arg9: memref<8x8x32xbf16, #tpu.memory_space<vmem>>) attributes {dimension_semantics = [], scalar_prefetch = 0 : i64, scratch_operands = 2 : i64, tpu.core_type = #tpu.core_type<tc>} {
    %cst = arith.constant 0.000000e+00 : f32
    %0 = vector.broadcast %cst : f32 to vector<8x32xf32>
    %cst_0 = arith.constant 0.000000e+00 : f32
    %1 = vector.broadcast %cst_0 : f32 to vector<8x32xf32>
    %c0_i32 = arith.constant 0 : i32
    %2 = arith.index_cast %c0_i32 : i32 to index
    %c0 = arith.constant 0 : index
    %c0_1 = arith.constant 0 : index
    %3 = vector.load %arg0[%2, %c0, %c0_1] : memref<8x8x128xf32, #tpu.memory_space<vmem>>, vector<1x8x128xf32>
    %4 = vector.shape_cast %3 : vector<1x8x128xf32> to vector<8x128xf32>
    %5 = arith.truncf %0 : vector<8x32xf32> to vector<8x32xbf16>
    %c0_2 = arith.constant 0 : index
    %c0_3 = arith.constant 0 : index
    %6 = vector.load %arg1[%c0_2, %c0_3] : memref<32x128xbf16, #tpu.memory_space<vmem>>, vector<32x128xbf16>
    %cst_4 = arith.constant dense<0.000000e+00> : vector<8x128xf32>
    %7 = tpu.matmul %5, %6, %cst_4 {dimension_numbers = #tpu.dot_dimension_numbers<[1], [0], [0], [1], [0, 0, 1, 1], [], []>} : vector<8x32xbf16>, vector<32x128xbf16>, vector<8x128xf32> -> vector<8x128xf32>
    %8 = arith.addf %4, %7 : vector<8x128xf32>
    %9 = arith.negf %8 : vector<8x128xf32>
    %10 = math.exp %9 : vector<8x128xf32>
    %cst_5 = arith.constant 1.000000e+00 : f32
    %11 = vector.broadcast %cst_5 : f32 to vector<8x128xf32>
    %12 = arith.addf %11, %10 : vector<8x128xf32>
    %13 = arith.divf %11, %12 : vector<8x128xf32>
    %14 = math.tanh %8 : vector<8x128xf32>
    %15 = vector.extract_strided_slice %13 {offsets = [0, 0], sizes = [8, 32], strides = [1, 1]} : vector<8x128xf32> to vector<8x32xf32>
    %16 = vector.extract_strided_slice %13 {offsets = [0, 32], sizes = [8, 32], strides = [1, 1]} : vector<8x128xf32> to vector<8x32xf32>
    %17 = vector.extract_strided_slice %14 {offsets = [0, 64], sizes = [8, 32], strides = [1, 1]} : vector<8x128xf32> to vector<8x32xf32>
    %18 = vector.extract_strided_slice %13 {offsets = [0, 96], sizes = [8, 32], strides = [1, 1]} : vector<8x128xf32> to vector<8x32xf32>
    %19 = arith.mulf %16, %1 : vector<8x32xf32>
    %20 = arith.mulf %15, %17 : vector<8x32xf32>
    %21 = arith.addf %19, %20 : vector<8x32xf32>
    %22 = math.tanh %21 : vector<8x32xf32>
    %23 = arith.mulf %18, %22 : vector<8x32xf32>
    %24 = arith.truncf %23 : vector<8x32xf32> to vector<8x32xbf16>
    %c0_i32_6 = arith.constant 0 : i32
    %25 = arith.addi %c0_i32_6, %c0_i32 : i32
    %26 = arith.index_cast %25 : i32 to index
    %c0_7 = arith.constant 0 : index
    %c0_8 = arith.constant 0 : index
    %27 = vector.load %arg9[%26, %c0_7, %c0_8] : memref<8x8x32xbf16, #tpu.memory_space<vmem>>, vector<1x8x32xbf16>
    %28 = vector.shape_cast %27 : vector<1x8x32xbf16> to vector<8x32xbf16>
    %29 = vector.shape_cast %24 : vector<8x32xbf16> to vector<1x8x32xbf16>
    tpu.vector_store %arg9[%26, %c0_7, %c0_8], %29 {strides = array<i32>} : memref<8x8x32xbf16, #tpu.memory_space<vmem>>, vector<1x8x32xbf16>,
    %c1_i32 = arith.constant 1 : i32
    %30 = arith.index_cast %c1_i32 : i32 to index
    %c0_9 = arith.constant 0 : index
    %c0_10 = arith.constant 0 : index
    %31 = vector.load %arg0[%30, %c0_9, %c0_10] : memref<8x8x128xf32, #tpu.memory_space<vmem>>, vector<1x8x128xf32>
    %32 = vector.shape_cast %31 : vector<1x8x128xf32> to vector<8x128xf32>
    %33 = arith.truncf %23 : vector<8x32xf32> to vector<8x32xbf16>
    %c0_11 = arith.constant 0 : index
    %c0_12 = arith.constant 0 : index
    %34 = vector.load %arg1[%c0_11, %c0_12] : memref<32x128xbf16, #tpu.memory_space<vmem>>, vector<32x128xbf16>
    %cst_13 = arith.constant dense<0.000000e+00> : vector<8x128xf32>
    %35 = tpu.matmul %33, %34, %cst_13 {dimension_numbers = #tpu.dot_dimension_numbers<[1], [0], [0], [1], [0, 0, 1, 1], [], []>} : vector<8x32xbf16>, vector<32x128xbf16>, vector<8x128xf32> -> vector<8x128xf32>
    %36 = arith.addf %32, %35 : vector<8x128xf32>
    %37 = arith.negf %36 : vector<8x128xf32>
    %38 = math.exp %37 : vector<8x128xf32>
    %cst_14 = arith.constant 1.000000e+00 : f32
    %39 = vector.broadcast %cst_14 : f32 to vector<8x128xf32>
    %40 = arith.addf %39, %38 : vector<8x128xf32>
    %41 = arith.divf %39, %40 : vector<8x128xf32>
    %42 = math.tanh %36 : vector<8x128xf32>
    %43 = vector.extract_strided_slice %41 {offsets = [0, 0], sizes = [8, 32], strides = [1, 1]} : vector<8x128xf32> to vector<8x32xf32>
    %44 = vector.extract_strided_slice %41 {offsets = [0, 32], sizes = [8, 32], strides = [1, 1]} : vector<8x128xf32> to vector<8x32xf32>
    %45 = vector.extract_strided_slice %42 {offsets = [0, 64], sizes = [8, 32], strides = [1, 1]} : vector<8x128xf32> to vector<8x32xf32>
    %46 = vector.extract_strided_slice %41 {offsets = [0, 96], sizes = [8, 32], strides = [1, 1]} : vector<8x128xf32> to vector<8x32xf32>
    %47 = arith.mulf %44, %21 : vector<8x32xf32>
    %48 = arith.mulf %43, %45 : vector<8x32xf32>
    %49 = arith.addf %47, %48 : vector<8x32xf32>
    %50 = math.tanh %49 : vector<8x32xf32>
    %51 = arith.mulf %46, %50 : vector<8x32xf32>
    %52 = arith.truncf %51 : vector<8x32xf32> to vector<8x32xbf16>
    %c0_i32_15 = arith.constant 0 : i32
    %53 = arith.addi %c0_i32_15, %c1_i32 : i32
    %54 = arith.index_cast %53 : i32 to index
    %c0_16 = arith.constant 0 : index
    %c0_17 = arith.constant 0 : index
    %55 = vector.load %arg9[%54, %c0_16, %c0_17] : memref<8x8x32xbf16, #tpu.memory_space<vmem>>, vector<1x8x32xbf16>
    %56 = vector.shape_cast %55 : vector<1x8x32xbf16> to vector<8x32xbf16>
    %57 = vector.shape_cast %52 : vector<8x32xbf16> to vector<1x8x32xbf16>
    tpu.vector_store %arg9[%54, %c0_16, %c0_17], %57 {strides = array<i32>} : memref<8x8x32xbf16, #tpu.memory_space<vmem>>, vector<1x8x32xbf16>,
    %c2_i32 = arith.constant 2 : i32
    %58 = arith.index_cast %c2_i32 : i32 to index
    %c0_18 = arith.constant 0 : index
    %c0_19 = arith.constant 0 : index
    %59 = vector.load %arg0[%58, %c0_18, %c0_19] : memref<8x8x128xf32, #tpu.memory_space<vmem>>, vector<1x8x128xf32>
    %60 = vector.shape_cast %59 : vector<1x8x128xf32> to vector<8x128xf32>
    %61 = arith.truncf %51 : vector<8x32xf32> to vector<8x32xbf16>
    %c0_20 = arith.constant 0 : index
    %c0_21 = arith.constant 0 : index
    %62 = vector.load %arg1[%c0_20, %c0_21] : memref<32x128xbf16, #tpu.memory_space<vmem>>, vector<32x128xbf16>
    %cst_22 = arith.constant dense<0.000000e+00> : vector<8x128xf32>
    %63 = tpu.matmul %61, %62, %cst_22 {dimension_numbers = #tpu.dot_dimension_numbers<[1], [0], [0], [1], [0, 0, 1, 1], [], []>} : vector<8x32xbf16>, vector<32x128xbf16>, vector<8x128xf32> -> vector<8x128xf32>
    %64 = arith.addf %60, %63 : vector<8x128xf32>
    %65 = arith.negf %64 : vector<8x128xf32>
    %66 = math.exp %65 : vector<8x128xf32>
    %cst_23 = arith.constant 1.000000e+00 : f32
    %67 = vector.broadcast %cst_23 : f32 to vector<8x128xf32>
    %68 = arith.addf %67, %66 : vector<8x128xf32>
    %69 = arith.divf %67, %68 : vector<8x128xf32>
    %70 = math.tanh %64 : vector<8x128xf32>
    %71 = vector.extract_strided_slice %69 {offsets = [0, 0], sizes = [8, 32], strides = [1, 1]} : vector<8x128xf32> to vector<8x32xf32>
    %72 = vector.extract_strided_slice %69 {offsets = [0, 32], sizes = [8, 32], strides = [1, 1]} : vector<8x128xf32> to vector<8x32xf32>
    %73 = vector.extract_strided_slice %70 {offsets = [0, 64], sizes = [8, 32], strides = [1, 1]} : vector<8x128xf32> to vector<8x32xf32>
    %74 = vector.extract_strided_slice %69 {offsets = [0, 96], sizes = [8, 32], strides = [1, 1]} : vector<8x128xf32> to vector<8x32xf32>
    %75 = arith.mulf %72, %49 : vector<8x32xf32>
    %76 = arith.mulf %71, %73 : vector<8x32xf32>
    %77 = arith.addf %75, %76 : vector<8x32xf32>
    %78 = math.tanh %77 : vector<8x32xf32>
    %79 = arith.mulf %74, %78 : vector<8x32xf32>
    %80 = arith.truncf %79 : vector<8x32xf32> to vector<8x32xbf16>
    %c0_i32_24 = arith.constant 0 : i32
    %81 = arith.addi %c0_i32_24, %c2_i32 : i32
    %82 = arith.index_cast %81 : i32 to index
    %c0_25 = arith.constant 0 : index
    %c0_26 = arith.constant 0 : index
    %83 = vector.load %arg9[%82, %c0_25, %c0_26] : memref<8x8x32xbf16, #tpu.memory_space<vmem>>, vector<1x8x32xbf16>
    %84 = vector.shape_cast %83 : vector<1x8x32xbf16> to vector<8x32xbf16>
    %85 = vector.shape_cast %80 : vector<8x32xbf16> to vector<1x8x32xbf16>
    tpu.vector_store %arg9[%82, %c0_25, %c0_26], %85 {strides = array<i32>} : memref<8x8x32xbf16, #tpu.memory_space<vmem>>, vector<1x8x32xbf16>,
    %c3_i32 = arith.constant 3 : i32
    %86 = arith.index_cast %c3_i32 : i32 to index
    %c0_27 = arith.constant 0 : index
    %c0_28 = arith.constant 0 : index
    %87 = vector.load %arg0[%86, %c0_27, %c0_28] : memref<8x8x128xf32, #tpu.memory_space<vmem>>, vector<1x8x128xf32>
    %88 = vector.shape_cast %87 : vector<1x8x128xf32> to vector<8x128xf32>
    %89 = arith.truncf %79 : vector<8x32xf32> to vector<8x32xbf16>
    %c0_29 = arith.constant 0 : index
    %c0_30 = arith.constant 0 : index
    %90 = vector.load %arg1[%c0_29, %c0_30] : memref<32x128xbf16, #tpu.memory_space<vmem>>, vector<32x128xbf16>
    %cst_31 = arith.constant dense<0.000000e+00> : vector<8x128xf32>
    %91 = tpu.matmul %89, %90, %cst_31 {dimension_numbers = #tpu.dot_dimension_numbers<[1], [0], [0], [1], [0, 0, 1, 1], [], []>} : vector<8x32xbf16>, vector<32x128xbf16>, vector<8x128xf32> -> vector<8x128xf32>
    %92 = arith.addf %88, %91 : vector<8x128xf32>
    %93 = arith.negf %92 : vector<8x128xf32>
    %94 = math.exp %93 : vector<8x128xf32>
    %cst_32 = arith.constant 1.000000e+00 : f32
    %95 = vector.broadcast %cst_32 : f32 to vector<8x128xf32>
    %96 = arith.addf %95, %94 : vector<8x128xf32>
    %97 = arith.divf %95, %96 : vector<8x128xf32>
    %98 = math.tanh %92 : vector<8x128xf32>
    %99 = vector.extract_strided_slice %97 {offsets = [0, 0], sizes = [8, 32], strides = [1, 1]} : vector<8x128xf32> to vector<8x32xf32>
    %100 = vector.extract_strided_slice %97 {offsets = [0, 32], sizes = [8, 32], strides = [1, 1]} : vector<8x128xf32> to vector<8x32xf32>
    %101 = vector.extract_strided_slice %98 {offsets = [0, 64], sizes = [8, 32], strides = [1, 1]} : vector<8x128xf32> to vector<8x32xf32>
    %102 = vector.extract_strided_slice %97 {offsets = [0, 96], sizes = [8, 32], strides = [1, 1]} : vector<8x128xf32> to vector<8x32xf32>
    %103 = arith.mulf %100, %77 : vector<8x32xf32>
    %104 = arith.mulf %99, %101 : vector<8x32xf32>
    %105 = arith.addf %103, %104 : vector<8x32xf32>
    %106 = math.tanh %105 : vector<8x32xf32>
    %107 = arith.mulf %102, %106 : vector<8x32xf32>
    %108 = arith.truncf %107 : vector<8x32xf32> to vector<8x32xbf16>
    %c0_i32_33 = arith.constant 0 : i32
    %109 = arith.addi %c0_i32_33, %c3_i32 : i32
    %110 = arith.index_cast %109 : i32 to index
    %c0_34 = arith.constant 0 : index
    %c0_35 = arith.constant 0 : index
    %111 = vector.load %arg9[%110, %c0_34, %c0_35] : memref<8x8x32xbf16, #tpu.memory_space<vmem>>, vector<1x8x32xbf16>
    %112 = vector.shape_cast %111 : vector<1x8x32xbf16> to vector<8x32xbf16>
    %113 = vector.shape_cast %108 : vector<8x32xbf16> to vector<1x8x32xbf16>
    tpu.vector_store %arg9[%110, %c0_34, %c0_35], %113 {strides = array<i32>} : memref<8x8x32xbf16, #tpu.memory_space<vmem>>, vector<1x8x32xbf16>,
    %c4_i32 = arith.constant 4 : i32
    %114 = arith.index_cast %c4_i32 : i32 to index
    %c0_36 = arith.constant 0 : index
    %c0_37 = arith.constant 0 : index
    %115 = vector.load %arg0[%114, %c0_36, %c0_37] : memref<8x8x128xf32, #tpu.memory_space<vmem>>, vector<1x8x128xf32>
    %116 = vector.shape_cast %115 : vector<1x8x128xf32> to vector<8x128xf32>
    %117 = arith.truncf %107 : vector<8x32xf32> to vector<8x32xbf16>
    %c0_38 = arith.constant 0 : index
    %c0_39 = arith.constant 0 : index
    %118 = vector.load %arg1[%c0_38, %c0_39] : memref<32x128xbf16, #tpu.memory_space<vmem>>, vector<32x128xbf16>
    %cst_40 = arith.constant dense<0.000000e+00> : vector<8x128xf32>
    %119 = tpu.matmul %117, %118, %cst_40 {dimension_numbers = #tpu.dot_dimension_numbers<[1], [0], [0], [1], [0, 0, 1, 1], [], []>} : vector<8x32xbf16>, vector<32x128xbf16>, vector<8x128xf32> -> vector<8x128xf32>
    %120 = arith.addf %116, %119 : vector<8x128xf32>
    %121 = arith.negf %120 : vector<8x128xf32>
    %122 = math.exp %121 : vector<8x128xf32>
    %cst_41 = arith.constant 1.000000e+00 : f32
    %123 = vector.broadcast %cst_41 : f32 to vector<8x128xf32>
    %124 = arith.addf %123, %122 : vector<8x128xf32>
    %125 = arith.divf %123, %124 : vector<8x128xf32>
    %126 = math.tanh %120 : vector<8x128xf32>
    %127 = vector.extract_strided_slice %125 {offsets = [0, 0], sizes = [8, 32], strides = [1, 1]} : vector<8x128xf32> to vector<8x32xf32>
    %128 = vector.extract_strided_slice %125 {offsets = [0, 32], sizes = [8, 32], strides = [1, 1]} : vector<8x128xf32> to vector<8x32xf32>
    %129 = vector.extract_strided_slice %126 {offsets = [0, 64], sizes = [8, 32], strides = [1, 1]} : vector<8x128xf32> to vector<8x32xf32>
    %130 = vector.extract_strided_slice %125 {offsets = [0, 96], sizes = [8, 32], strides = [1, 1]} : vector<8x128xf32> to vector<8x32xf32>
    %131 = arith.mulf %128, %105 : vector<8x32xf32>
    %132 = arith.mulf %127, %129 : vector<8x32xf32>
    %133 = arith.addf %131, %132 : vector<8x32xf32>
    %134 = math.tanh %133 : vector<8x32xf32>
    %135 = arith.mulf %130, %134 : vector<8x32xf32>
    %136 = arith.truncf %135 : vector<8x32xf32> to vector<8x32xbf16>
    %c0_i32_42 = arith.constant 0 : i32
    %137 = arith.addi %c0_i32_42, %c4_i32 : i32
    %138 = arith.index_cast %137 : i32 to index
    %c0_43 = arith.constant 0 : index
    %c0_44 = arith.constant 0 : index
    %139 = vector.load %arg9[%138, %c0_43, %c0_44] : memref<8x8x32xbf16, #tpu.memory_space<vmem>>, vector<1x8x32xbf16>
    %140 = vector.shape_cast %139 : vector<1x8x32xbf16> to vector<8x32xbf16>
    %141 = vector.shape_cast %136 : vector<8x32xbf16> to vector<1x8x32xbf16>
    tpu.vector_store %arg9[%138, %c0_43, %c0_44], %141 {strides = array<i32>} : memref<8x8x32xbf16, #tpu.memory_space<vmem>>, vector<1x8x32xbf16>,
    %c5_i32 = arith.constant 5 : i32
    %142 = arith.index_cast %c5_i32 : i32 to index
    %c0_45 = arith.constant 0 : index
    %c0_46 = arith.constant 0 : index
    %143 = vector.load %arg0[%142, %c0_45, %c0_46] : memref<8x8x128xf32, #tpu.memory_space<vmem>>, vector<1x8x128xf32>
    %144 = vector.shape_cast %143 : vector<1x8x128xf32> to vector<8x128xf32>
    %145 = arith.truncf %135 : vector<8x32xf32> to vector<8x32xbf16>
    %c0_47 = arith.constant 0 : index
    %c0_48 = arith.constant 0 : index
    %146 = vector.load %arg1[%c0_47, %c0_48] : memref<32x128xbf16, #tpu.memory_space<vmem>>, vector<32x128xbf16>
    %cst_49 = arith.constant dense<0.000000e+00> : vector<8x128xf32>
    %147 = tpu.matmul %145, %146, %cst_49 {dimension_numbers = #tpu.dot_dimension_numbers<[1], [0], [0], [1], [0, 0, 1, 1], [], []>} : vector<8x32xbf16>, vector<32x128xbf16>, vector<8x128xf32> -> vector<8x128xf32>
    %148 = arith.addf %144, %147 : vector<8x128xf32>
    %149 = arith.negf %148 : vector<8x128xf32>
    %150 = math.exp %149 : vector<8x128xf32>
    %cst_50 = arith.constant 1.000000e+00 : f32
    %151 = vector.broadcast %cst_50 : f32 to vector<8x128xf32>
    %152 = arith.addf %151, %150 : vector<8x128xf32>
    %153 = arith.divf %151, %152 : vector<8x128xf32>
    %154 = math.tanh %148 : vector<8x128xf32>
    %155 = vector.extract_strided_slice %153 {offsets = [0, 0], sizes = [8, 32], strides = [1, 1]} : vector<8x128xf32> to vector<8x32xf32>
    %156 = vector.extract_strided_slice %153 {offsets = [0, 32], sizes = [8, 32], strides = [1, 1]} : vector<8x128xf32> to vector<8x32xf32>
    %157 = vector.extract_strided_slice %154 {offsets = [0, 64], sizes = [8, 32], strides = [1, 1]} : vector<8x128xf32> to vector<8x32xf32>
    %158 = vector.extract_strided_slice %153 {offsets = [0, 96], sizes = [8, 32], strides = [1, 1]} : vector<8x128xf32> to vector<8x32xf32>
    %159 = arith.mulf %156, %133 : vector<8x32xf32>
    %160 = arith.mulf %155, %157 : vector<8x32xf32>
    %161 = arith.addf %159, %160 : vector<8x32xf32>
    %162 = math.tanh %161 : vector<8x32xf32>
    %163 = arith.mulf %158, %162 : vector<8x32xf32>
    %164 = arith.truncf %163 : vector<8x32xf32> to vector<8x32xbf16>
    %c0_i32_51 = arith.constant 0 : i32
    %165 = arith.addi %c0_i32_51, %c5_i32 : i32
    %166 = arith.index_cast %165 : i32 to index
    %c0_52 = arith.constant 0 : index
    %c0_53 = arith.constant 0 : index
    %167 = vector.load %arg9[%166, %c0_52, %c0_53] : memref<8x8x32xbf16, #tpu.memory_space<vmem>>, vector<1x8x32xbf16>
    %168 = vector.shape_cast %167 : vector<1x8x32xbf16> to vector<8x32xbf16>
    %169 = vector.shape_cast %164 : vector<8x32xbf16> to vector<1x8x32xbf16>
    tpu.vector_store %arg9[%166, %c0_52, %c0_53], %169 {strides = array<i32>} : memref<8x8x32xbf16, #tpu.memory_space<vmem>>, vector<1x8x32xbf16>,
    %c6_i32 = arith.constant 6 : i32
    %170 = arith.index_cast %c6_i32 : i32 to index
    %c0_54 = arith.constant 0 : index
    %c0_55 = arith.constant 0 : index
    %171 = vector.load %arg0[%170, %c0_54, %c0_55] : memref<8x8x128xf32, #tpu.memory_space<vmem>>, vector<1x8x128xf32>
    %172 = vector.shape_cast %171 : vector<1x8x128xf32> to vector<8x128xf32>
    %173 = arith.truncf %163 : vector<8x32xf32> to vector<8x32xbf16>
    %c0_56 = arith.constant 0 : index
    %c0_57 = arith.constant 0 : index
    %174 = vector.load %arg1[%c0_56, %c0_57] : memref<32x128xbf16, #tpu.memory_space<vmem>>, vector<32x128xbf16>
    %cst_58 = arith.constant dense<0.000000e+00> : vector<8x128xf32>
    %175 = tpu.matmul %173, %174, %cst_58 {dimension_numbers = #tpu.dot_dimension_numbers<[1], [0], [0], [1], [0, 0, 1, 1], [], []>} : vector<8x32xbf16>, vector<32x128xbf16>, vector<8x128xf32> -> vector<8x128xf32>
    %176 = arith.addf %172, %175 : vector<8x128xf32>
    %177 = arith.negf %176 : vector<8x128xf32>
    %178 = math.exp %177 : vector<8x128xf32>
    %cst_59 = arith.constant 1.000000e+00 : f32
    %179 = vector.broadcast %cst_59 : f32 to vector<8x128xf32>
    %180 = arith.addf %179, %178 : vector<8x128xf32>
    %181 = arith.divf %179, %180 : vector<8x128xf32>
    %182 = math.tanh %176 : vector<8x128xf32>
    %183 = vector.extract_strided_slice %181 {offsets = [0, 0], sizes = [8, 32], strides = [1, 1]} : vector<8x128xf32> to vector<8x32xf32>
    %184 = vector.extract_strided_slice %181 {offsets = [0, 32], sizes = [8, 32], strides = [1, 1]} : vector<8x128xf32> to vector<8x32xf32>
    %185 = vector.extract_strided_slice %182 {offsets = [0, 64], sizes = [8, 32], strides = [1, 1]} : vector<8x128xf32> to vector<8x32xf32>
    %186 = vector.extract_strided_slice %181 {offsets = [0, 96], sizes = [8, 32], strides = [1, 1]} : vector<8x128xf32> to vector<8x32xf32>
    %187 = arith.mulf %184, %161 : vector<8x32xf32>
    %188 = arith.mulf %183, %185 : vector<8x32xf32>
    %189 = arith.addf %187, %188 : vector<8x32xf32>
    %190 = math.tanh %189 : vector<8x32xf32>
    %191 = arith.mulf %186, %190 : vector<8x32xf32>
    %192 = arith.truncf %191 : vector<8x32xf32> to vector<8x32xbf16>
    %c0_i32_60 = arith.constant 0 : i32
    %193 = arith.addi %c0_i32_60, %c6_i32 : i32
    %194 = arith.index_cast %193 : i32 to index
    %c0_61 = arith.constant 0 : index
    %c0_62 = arith.constant 0 : index
    %195 = vector.load %arg9[%194, %c0_61, %c0_62] : memref<8x8x32xbf16, #tpu.memory_space<vmem>>, vector<1x8x32xbf16>
    %196 = vector.shape_cast %195 : vector<1x8x32xbf16> to vector<8x32xbf16>
    %197 = vector.shape_cast %192 : vector<8x32xbf16> to vector<1x8x32xbf16>
    tpu.vector_store %arg9[%194, %c0_61, %c0_62], %197 {strides = array<i32>} : memref<8x8x32xbf16, #tpu.memory_space<vmem>>, vector<1x8x32xbf16>,
    %c7_i32 = arith.constant 7 : i32
    %198 = arith.index_cast %c7_i32 : i32 to index
    %c0_63 = arith.constant 0 : index
    %c0_64 = arith.constant 0 : index
    %199 = vector.load %arg0[%198, %c0_63, %c0_64] : memref<8x8x128xf32, #tpu.memory_space<vmem>>, vector<1x8x128xf32>
    %200 = vector.shape_cast %199 : vector<1x8x128xf32> to vector<8x128xf32>
    %201 = arith.truncf %191 : vector<8x32xf32> to vector<8x32xbf16>
    %c0_65 = arith.constant 0 : index
    %c0_66 = arith.constant 0 : index
    %202 = vector.load %arg1[%c0_65, %c0_66] : memref<32x128xbf16, #tpu.memory_space<vmem>>, vector<32x128xbf16>
    %cst_67 = arith.constant dense<0.000000e+00> : vector<8x128xf32>
    %203 = tpu.matmul %201, %202, %cst_67 {dimension_numbers = #tpu.dot_dimension_numbers<[1], [0], [0], [1], [0, 0, 1, 1], [], []>} : vector<8x32xbf16>, vector<32x128xbf16>, vector<8x128xf32> -> vector<8x128xf32>
    %204 = arith.addf %200, %203 : vector<8x128xf32>
    %205 = arith.negf %204 : vector<8x128xf32>
    %206 = math.exp %205 : vector<8x128xf32>
    %cst_68 = arith.constant 1.000000e+00 : f32
    %207 = vector.broadcast %cst_68 : f32 to vector<8x128xf32>
    %208 = arith.addf %207, %206 : vector<8x128xf32>
    %209 = arith.divf %207, %208 : vector<8x128xf32>
    %210 = math.tanh %204 : vector<8x128xf32>
    %211 = vector.extract_strided_slice %209 {offsets = [0, 0], sizes = [8, 32], strides = [1, 1]} : vector<8x128xf32> to vector<8x32xf32>
    %212 = vector.extract_strided_slice %209 {offsets = [0, 32], sizes = [8, 32], strides = [1, 1]} : vector<8x128xf32> to vector<8x32xf32>
    %213 = vector.extract_strided_slice %210 {offsets = [0, 64], sizes = [8, 32], strides = [1, 1]} : vector<8x128xf32> to vector<8x32xf32>
    %214 = vector.extract_strided_slice %209 {offsets = [0, 96], sizes = [8, 32], strides = [1, 1]} : vector<8x128xf32> to vector<8x32xf32>
    %215 = arith.mulf %212, %189 : vector<8x32xf32>
    %216 = arith.mulf %211, %213 : vector<8x32xf32>
    %217 = arith.addf %215, %216 : vector<8x32xf32>
    %218 = math.tanh %217 : vector<8x32xf32>
    %219 = arith.mulf %214, %218 : vector<8x32xf32>
    %220 = arith.truncf %219 : vector<8x32xf32> to vector<8x32xbf16>
    %c0_i32_69 = arith.constant 0 : i32
    %221 = arith.addi %c0_i32_69, %c7_i32 : i32
    %222 = arith.index_cast %221 : i32 to index
    %c0_70 = arith.constant 0 : index
    %c0_71 = arith.constant 0 : index
    %223 = vector.load %arg9[%222, %c0_70, %c0_71] : memref<8x8x32xbf16, #tpu.memory_space<vmem>>, vector<1x8x32xbf16>
    %224 = vector.shape_cast %223 : vector<1x8x32xbf16> to vector<8x32xbf16>
    %225 = vector.shape_cast %220 : vector<8x32xbf16> to vector<1x8x32xbf16>
    tpu.vector_store %arg9[%222, %c0_70, %c0_71], %225 {strides = array<i32>} : memref<8x8x32xbf16, #tpu.memory_space<vmem>>, vector<1x8x32xbf16>,
    %c8_i32 = arith.constant 8 : i32
    %c0_72 = arith.constant 0 : index
    %c0_73 = arith.constant 0 : index
    %c0_74 = arith.constant 0 : index
    %226 = vector.load %arg9[%c0_72, %c0_73, %c0_74] : memref<8x8x32xbf16, #tpu.memory_space<vmem>>, vector<8x8x32xbf16>
    %227 = arith.extf %226 : vector<8x8x32xbf16> to vector<8x8x32xf32>
    %228 = vector.shape_cast %227 : vector<8x8x32xf32> to vector<64x32xf32>
    %229 = arith.truncf %228 : vector<64x32xf32> to vector<64x32xbf16>
    %c0_75 = arith.constant 0 : index
    %c0_76 = arith.constant 0 : index
    %230 = vector.load %arg3[%c0_75, %c0_76] : memref<32x128xbf16, #tpu.memory_space<vmem>>, vector<32x128xbf16>
    %cst_77 = arith.constant dense<0.000000e+00> : vector<64x128xf32>
    %231 = tpu.matmul %229, %230, %cst_77 {dimension_numbers = #tpu.dot_dimension_numbers<[1], [0], [0], [1], [0, 0, 1, 1], [], []>} : vector<64x32xbf16>, vector<32x128xbf16>, vector<64x128xf32> -> vector<64x128xf32>
    %c0_78 = arith.constant 0 : index
    %c0_79 = arith.constant 0 : index
    %232 = vector.load %arg4[%c0_78, %c0_79] : memref<1x128xf32, #tpu.memory_space<vmem>>, vector<1x128xf32>
    %233 = vector.broadcast %232 : vector<1x128xf32> to vector<64x128xf32>
    %234 = arith.addf %231, %233 : vector<64x128xf32>
    %235 = vector.shape_cast %234 : vector<64x128xf32> to vector<8x8x128xf32>
    %c0_80 = arith.constant 0 : index
    %c0_81 = arith.constant 0 : index
    %c0_82 = arith.constant 0 : index
    %236 = vector.load %arg8[%c0_80, %c0_81, %c0_82] : memref<8x8x128xf32, #tpu.memory_space<vmem>>, vector<8x8x128xf32>
    tpu.vector_store %arg8[%c0_80, %c0_81, %c0_82], %235 {strides = array<i32>} : memref<8x8x128xf32, #tpu.memory_space<vmem>>, vector<8x8x128xf32>,
    %c0_i32_83 = arith.constant 0 : i32
    %237 = arith.index_cast %c0_i32_83 : i32 to index
    %c0_84 = arith.constant 0 : index
    %c0_85 = arith.constant 0 : index
    %238 = vector.load %arg8[%237, %c0_84, %c0_85] : memref<8x8x128xf32, #tpu.memory_space<vmem>>, vector<1x8x128xf32>
    %239 = vector.shape_cast %238 : vector<1x8x128xf32> to vector<8x128xf32>
    %240 = arith.truncf %0 : vector<8x32xf32> to vector<8x32xbf16>
    %c0_86 = arith.constant 0 : index
    %c0_87 = arith.constant 0 : index
    %241 = vector.load %arg2[%c0_86, %c0_87] : memref<32x128xbf16, #tpu.memory_space<vmem>>, vector<32x128xbf16>
    %cst_88 = arith.constant dense<0.000000e+00> : vector<8x128xf32>
    %242 = tpu.matmul %240, %241, %cst_88 {dimension_numbers = #tpu.dot_dimension_numbers<[1], [0], [0], [1], [0, 0, 1, 1], [], []>} : vector<8x32xbf16>, vector<32x128xbf16>, vector<8x128xf32> -> vector<8x128xf32>
    %243 = arith.addf %239, %242 : vector<8x128xf32>
    %244 = arith.negf %243 : vector<8x128xf32>
    %245 = math.exp %244 : vector<8x128xf32>
    %cst_89 = arith.constant 1.000000e+00 : f32
    %246 = vector.broadcast %cst_89 : f32 to vector<8x128xf32>
    %247 = arith.addf %246, %245 : vector<8x128xf32>
    %248 = arith.divf %246, %247 : vector<8x128xf32>
    %249 = math.tanh %243 : vector<8x128xf32>
    %250 = vector.extract_strided_slice %248 {offsets = [0, 0], sizes = [8, 32], strides = [1, 1]} : vector<8x128xf32> to vector<8x32xf32>
    %251 = vector.extract_strided_slice %248 {offsets = [0, 32], sizes = [8, 32], strides = [1, 1]} : vector<8x128xf32> to vector<8x32xf32>
    %252 = vector.extract_strided_slice %249 {offsets = [0, 64], sizes = [8, 32], strides = [1, 1]} : vector<8x128xf32> to vector<8x32xf32>
    %253 = vector.extract_strided_slice %248 {offsets = [0, 96], sizes = [8, 32], strides = [1, 1]} : vector<8x128xf32> to vector<8x32xf32>
    %254 = arith.mulf %251, %1 : vector<8x32xf32>
    %255 = arith.mulf %250, %252 : vector<8x32xf32>
    %256 = arith.addf %254, %255 : vector<8x32xf32>
    %257 = math.tanh %256 : vector<8x32xf32>
    %258 = arith.mulf %253, %257 : vector<8x32xf32>
    %c1_i32_90 = arith.constant 1 : i32
    %259 = arith.index_cast %c1_i32_90 : i32 to index
    %c0_91 = arith.constant 0 : index
    %c0_92 = arith.constant 0 : index
    %260 = vector.load %arg8[%259, %c0_91, %c0_92] : memref<8x8x128xf32, #tpu.memory_space<vmem>>, vector<1x8x128xf32>
    %261 = vector.shape_cast %260 : vector<1x8x128xf32> to vector<8x128xf32>
    %262 = arith.truncf %258 : vector<8x32xf32> to vector<8x32xbf16>
    %c0_93 = arith.constant 0 : index
    %c0_94 = arith.constant 0 : index
    %263 = vector.load %arg2[%c0_93, %c0_94] : memref<32x128xbf16, #tpu.memory_space<vmem>>, vector<32x128xbf16>
    %cst_95 = arith.constant dense<0.000000e+00> : vector<8x128xf32>
    %264 = tpu.matmul %262, %263, %cst_95 {dimension_numbers = #tpu.dot_dimension_numbers<[1], [0], [0], [1], [0, 0, 1, 1], [], []>} : vector<8x32xbf16>, vector<32x128xbf16>, vector<8x128xf32> -> vector<8x128xf32>
    %265 = arith.addf %261, %264 : vector<8x128xf32>
    %266 = arith.negf %265 : vector<8x128xf32>
    %267 = math.exp %266 : vector<8x128xf32>
    %cst_96 = arith.constant 1.000000e+00 : f32
    %268 = vector.broadcast %cst_96 : f32 to vector<8x128xf32>
    %269 = arith.addf %268, %267 : vector<8x128xf32>
    %270 = arith.divf %268, %269 : vector<8x128xf32>
    %271 = math.tanh %265 : vector<8x128xf32>
    %272 = vector.extract_strided_slice %270 {offsets = [0, 0], sizes = [8, 32], strides = [1, 1]} : vector<8x128xf32> to vector<8x32xf32>
    %273 = vector.extract_strided_slice %270 {offsets = [0, 32], sizes = [8, 32], strides = [1, 1]} : vector<8x128xf32> to vector<8x32xf32>
    %274 = vector.extract_strided_slice %271 {offsets = [0, 64], sizes = [8, 32], strides = [1, 1]} : vector<8x128xf32> to vector<8x32xf32>
    %275 = vector.extract_strided_slice %270 {offsets = [0, 96], sizes = [8, 32], strides = [1, 1]} : vector<8x128xf32> to vector<8x32xf32>
    %276 = arith.mulf %273, %256 : vector<8x32xf32>
    %277 = arith.mulf %272, %274 : vector<8x32xf32>
    %278 = arith.addf %276, %277 : vector<8x32xf32>
    %279 = math.tanh %278 : vector<8x32xf32>
    %280 = arith.mulf %275, %279 : vector<8x32xf32>
    %c2_i32_97 = arith.constant 2 : i32
    %281 = arith.index_cast %c2_i32_97 : i32 to index
    %c0_98 = arith.constant 0 : index
    %c0_99 = arith.constant 0 : index
    %282 = vector.load %arg8[%281, %c0_98, %c0_99] : memref<8x8x128xf32, #tpu.memory_space<vmem>>, vector<1x8x128xf32>
    %283 = vector.shape_cast %282 : vector<1x8x128xf32> to vector<8x128xf32>
    %284 = arith.truncf %280 : vector<8x32xf32> to vector<8x32xbf16>
    %c0_100 = arith.constant 0 : index
    %c0_101 = arith.constant 0 : index
    %285 = vector.load %arg2[%c0_100, %c0_101] : memref<32x128xbf16, #tpu.memory_space<vmem>>, vector<32x128xbf16>
    %cst_102 = arith.constant dense<0.000000e+00> : vector<8x128xf32>
    %286 = tpu.matmul %284, %285, %cst_102 {dimension_numbers = #tpu.dot_dimension_numbers<[1], [0], [0], [1], [0, 0, 1, 1], [], []>} : vector<8x32xbf16>, vector<32x128xbf16>, vector<8x128xf32> -> vector<8x128xf32>
    %287 = arith.addf %283, %286 : vector<8x128xf32>
    %288 = arith.negf %287 : vector<8x128xf32>
    %289 = math.exp %288 : vector<8x128xf32>
    %cst_103 = arith.constant 1.000000e+00 : f32
    %290 = vector.broadcast %cst_103 : f32 to vector<8x128xf32>
    %291 = arith.addf %290, %289 : vector<8x128xf32>
    %292 = arith.divf %290, %291 : vector<8x128xf32>
    %293 = math.tanh %287 : vector<8x128xf32>
    %294 = vector.extract_strided_slice %292 {offsets = [0, 0], sizes = [8, 32], strides = [1, 1]} : vector<8x128xf32> to vector<8x32xf32>
    %295 = vector.extract_strided_slice %292 {offsets = [0, 32], sizes = [8, 32], strides = [1, 1]} : vector<8x128xf32> to vector<8x32xf32>
    %296 = vector.extract_strided_slice %293 {offsets = [0, 64], sizes = [8, 32], strides = [1, 1]} : vector<8x128xf32> to vector<8x32xf32>
    %297 = vector.extract_strided_slice %292 {offsets = [0, 96], sizes = [8, 32], strides = [1, 1]} : vector<8x128xf32> to vector<8x32xf32>
    %298 = arith.mulf %295, %278 : vector<8x32xf32>
    %299 = arith.mulf %294, %296 : vector<8x32xf32>
    %300 = arith.addf %298, %299 : vector<8x32xf32>
    %301 = math.tanh %300 : vector<8x32xf32>
    %302 = arith.mulf %297, %301 : vector<8x32xf32>
    %c3_i32_104 = arith.constant 3 : i32
    %303 = arith.index_cast %c3_i32_104 : i32 to index
    %c0_105 = arith.constant 0 : index
    %c0_106 = arith.constant 0 : index
    %304 = vector.load %arg8[%303, %c0_105, %c0_106] : memref<8x8x128xf32, #tpu.memory_space<vmem>>, vector<1x8x128xf32>
    %305 = vector.shape_cast %304 : vector<1x8x128xf32> to vector<8x128xf32>
    %306 = arith.truncf %302 : vector<8x32xf32> to vector<8x32xbf16>
    %c0_107 = arith.constant 0 : index
    %c0_108 = arith.constant 0 : index
    %307 = vector.load %arg2[%c0_107, %c0_108] : memref<32x128xbf16, #tpu.memory_space<vmem>>, vector<32x128xbf16>
    %cst_109 = arith.constant dense<0.000000e+00> : vector<8x128xf32>
    %308 = tpu.matmul %306, %307, %cst_109 {dimension_numbers = #tpu.dot_dimension_numbers<[1], [0], [0], [1], [0, 0, 1, 1], [], []>} : vector<8x32xbf16>, vector<32x128xbf16>, vector<8x128xf32> -> vector<8x128xf32>
    %309 = arith.addf %305, %308 : vector<8x128xf32>
    %310 = arith.negf %309 : vector<8x128xf32>
    %311 = math.exp %310 : vector<8x128xf32>
    %cst_110 = arith.constant 1.000000e+00 : f32
    %312 = vector.broadcast %cst_110 : f32 to vector<8x128xf32>
    %313 = arith.addf %312, %311 : vector<8x128xf32>
    %314 = arith.divf %312, %313 : vector<8x128xf32>
    %315 = math.tanh %309 : vector<8x128xf32>
    %316 = vector.extract_strided_slice %314 {offsets = [0, 0], sizes = [8, 32], strides = [1, 1]} : vector<8x128xf32> to vector<8x32xf32>
    %317 = vector.extract_strided_slice %314 {offsets = [0, 32], sizes = [8, 32], strides = [1, 1]} : vector<8x128xf32> to vector<8x32xf32>
    %318 = vector.extract_strided_slice %315 {offsets = [0, 64], sizes = [8, 32], strides = [1, 1]} : vector<8x128xf32> to vector<8x32xf32>
    %319 = vector.extract_strided_slice %314 {offsets = [0, 96], sizes = [8, 32], strides = [1, 1]} : vector<8x128xf32> to vector<8x32xf32>
    %320 = arith.mulf %317, %300 : vector<8x32xf32>
    %321 = arith.mulf %316, %318 : vector<8x32xf32>
    %322 = arith.addf %320, %321 : vector<8x32xf32>
    %323 = math.tanh %322 : vector<8x32xf32>
    %324 = arith.mulf %319, %323 : vector<8x32xf32>
    %c4_i32_111 = arith.constant 4 : i32
    %325 = arith.index_cast %c4_i32_111 : i32 to index
    %c0_112 = arith.constant 0 : index
    %c0_113 = arith.constant 0 : index
    %326 = vector.load %arg8[%325, %c0_112, %c0_113] : memref<8x8x128xf32, #tpu.memory_space<vmem>>, vector<1x8x128xf32>
    %327 = vector.shape_cast %326 : vector<1x8x128xf32> to vector<8x128xf32>
    %328 = arith.truncf %324 : vector<8x32xf32> to vector<8x32xbf16>
    %c0_114 = arith.constant 0 : index
    %c0_115 = arith.constant 0 : index
    %329 = vector.load %arg2[%c0_114, %c0_115] : memref<32x128xbf16, #tpu.memory_space<vmem>>, vector<32x128xbf16>
    %cst_116 = arith.constant dense<0.000000e+00> : vector<8x128xf32>
    %330 = tpu.matmul %328, %329, %cst_116 {dimension_numbers = #tpu.dot_dimension_numbers<[1], [0], [0], [1], [0, 0, 1, 1], [], []>} : vector<8x32xbf16>, vector<32x128xbf16>, vector<8x128xf32> -> vector<8x128xf32>
    %331 = arith.addf %327, %330 : vector<8x128xf32>
    %332 = arith.negf %331 : vector<8x128xf32>
    %333 = math.exp %332 : vector<8x128xf32>
    %cst_117 = arith.constant 1.000000e+00 : f32
    %334 = vector.broadcast %cst_117 : f32 to vector<8x128xf32>
    %335 = arith.addf %334, %333 : vector<8x128xf32>
    %336 = arith.divf %334, %335 : vector<8x128xf32>
    %337 = math.tanh %331 : vector<8x128xf32>
    %338 = vector.extract_strided_slice %336 {offsets = [0, 0], sizes = [8, 32], strides = [1, 1]} : vector<8x128xf32> to vector<8x32xf32>
    %339 = vector.extract_strided_slice %336 {offsets = [0, 32], sizes = [8, 32], strides = [1, 1]} : vector<8x128xf32> to vector<8x32xf32>
    %340 = vector.extract_strided_slice %337 {offsets = [0, 64], sizes = [8, 32], strides = [1, 1]} : vector<8x128xf32> to vector<8x32xf32>
    %341 = vector.extract_strided_slice %336 {offsets = [0, 96], sizes = [8, 32], strides = [1, 1]} : vector<8x128xf32> to vector<8x32xf32>
    %342 = arith.mulf %339, %322 : vector<8x32xf32>
    %343 = arith.mulf %338, %340 : vector<8x32xf32>
    %344 = arith.addf %342, %343 : vector<8x32xf32>
    %345 = math.tanh %344 : vector<8x32xf32>
    %346 = arith.mulf %341, %345 : vector<8x32xf32>
    %c5_i32_118 = arith.constant 5 : i32
    %347 = arith.index_cast %c5_i32_118 : i32 to index
    %c0_119 = arith.constant 0 : index
    %c0_120 = arith.constant 0 : index
    %348 = vector.load %arg8[%347, %c0_119, %c0_120] : memref<8x8x128xf32, #tpu.memory_space<vmem>>, vector<1x8x128xf32>
    %349 = vector.shape_cast %348 : vector<1x8x128xf32> to vector<8x128xf32>
    %350 = arith.truncf %346 : vector<8x32xf32> to vector<8x32xbf16>
    %c0_121 = arith.constant 0 : index
    %c0_122 = arith.constant 0 : index
    %351 = vector.load %arg2[%c0_121, %c0_122] : memref<32x128xbf16, #tpu.memory_space<vmem>>, vector<32x128xbf16>
    %cst_123 = arith.constant dense<0.000000e+00> : vector<8x128xf32>
    %352 = tpu.matmul %350, %351, %cst_123 {dimension_numbers = #tpu.dot_dimension_numbers<[1], [0], [0], [1], [0, 0, 1, 1], [], []>} : vector<8x32xbf16>, vector<32x128xbf16>, vector<8x128xf32> -> vector<8x128xf32>
    %353 = arith.addf %349, %352 : vector<8x128xf32>
    %354 = arith.negf %353 : vector<8x128xf32>
    %355 = math.exp %354 : vector<8x128xf32>
    %cst_124 = arith.constant 1.000000e+00 : f32
    %356 = vector.broadcast %cst_124 : f32 to vector<8x128xf32>
    %357 = arith.addf %356, %355 : vector<8x128xf32>
    %358 = arith.divf %356, %357 : vector<8x128xf32>
    %359 = math.tanh %353 : vector<8x128xf32>
    %360 = vector.extract_strided_slice %358 {offsets = [0, 0], sizes = [8, 32], strides = [1, 1]} : vector<8x128xf32> to vector<8x32xf32>
    %361 = vector.extract_strided_slice %358 {offsets = [0, 32], sizes = [8, 32], strides = [1, 1]} : vector<8x128xf32> to vector<8x32xf32>
    %362 = vector.extract_strided_slice %359 {offsets = [0, 64], sizes = [8, 32], strides = [1, 1]} : vector<8x128xf32> to vector<8x32xf32>
    %363 = vector.extract_strided_slice %358 {offsets = [0, 96], sizes = [8, 32], strides = [1, 1]} : vector<8x128xf32> to vector<8x32xf32>
    %364 = arith.mulf %361, %344 : vector<8x32xf32>
    %365 = arith.mulf %360, %362 : vector<8x32xf32>
    %366 = arith.addf %364, %365 : vector<8x32xf32>
    %367 = math.tanh %366 : vector<8x32xf32>
    %368 = arith.mulf %363, %367 : vector<8x32xf32>
    %c6_i32_125 = arith.constant 6 : i32
    %369 = arith.index_cast %c6_i32_125 : i32 to index
    %c0_126 = arith.constant 0 : index
    %c0_127 = arith.constant 0 : index
    %370 = vector.load %arg8[%369, %c0_126, %c0_127] : memref<8x8x128xf32, #tpu.memory_space<vmem>>, vector<1x8x128xf32>
    %371 = vector.shape_cast %370 : vector<1x8x128xf32> to vector<8x128xf32>
    %372 = arith.truncf %368 : vector<8x32xf32> to vector<8x32xbf16>
    %c0_128 = arith.constant 0 : index
    %c0_129 = arith.constant 0 : index
    %373 = vector.load %arg2[%c0_128, %c0_129] : memref<32x128xbf16, #tpu.memory_space<vmem>>, vector<32x128xbf16>
    %cst_130 = arith.constant dense<0.000000e+00> : vector<8x128xf32>
    %374 = tpu.matmul %372, %373, %cst_130 {dimension_numbers = #tpu.dot_dimension_numbers<[1], [0], [0], [1], [0, 0, 1, 1], [], []>} : vector<8x32xbf16>, vector<32x128xbf16>, vector<8x128xf32> -> vector<8x128xf32>
    %375 = arith.addf %371, %374 : vector<8x128xf32>
    %376 = arith.negf %375 : vector<8x128xf32>
    %377 = math.exp %376 : vector<8x128xf32>
    %cst_131 = arith.constant 1.000000e+00 : f32
    %378 = vector.broadcast %cst_131 : f32 to vector<8x128xf32>
    %379 = arith.addf %378, %377 : vector<8x128xf32>
    %380 = arith.divf %378, %379 : vector<8x128xf32>
    %381 = math.tanh %375 : vector<8x128xf32>
    %382 = vector.extract_strided_slice %380 {offsets = [0, 0], sizes = [8, 32], strides = [1, 1]} : vector<8x128xf32> to vector<8x32xf32>
    %383 = vector.extract_strided_slice %380 {offsets = [0, 32], sizes = [8, 32], strides = [1, 1]} : vector<8x128xf32> to vector<8x32xf32>
    %384 = vector.extract_strided_slice %381 {offsets = [0, 64], sizes = [8, 32], strides = [1, 1]} : vector<8x128xf32> to vector<8x32xf32>
    %385 = vector.extract_strided_slice %380 {offsets = [0, 96], sizes = [8, 32], strides = [1, 1]} : vector<8x128xf32> to vector<8x32xf32>
    %386 = arith.mulf %383, %366 : vector<8x32xf32>
    %387 = arith.mulf %382, %384 : vector<8x32xf32>
    %388 = arith.addf %386, %387 : vector<8x32xf32>
    %389 = math.tanh %388 : vector<8x32xf32>
    %390 = arith.mulf %385, %389 : vector<8x32xf32>
    %c7_i32_132 = arith.constant 7 : i32
    %391 = arith.index_cast %c7_i32_132 : i32 to index
    %c0_133 = arith.constant 0 : index
    %c0_134 = arith.constant 0 : index
    %392 = vector.load %arg8[%391, %c0_133, %c0_134] : memref<8x8x128xf32, #tpu.memory_space<vmem>>, vector<1x8x128xf32>
    %393 = vector.shape_cast %392 : vector<1x8x128xf32> to vector<8x128xf32>
    %394 = arith.truncf %390 : vector<8x32xf32> to vector<8x32xbf16>
    %c0_135 = arith.constant 0 : index
    %c0_136 = arith.constant 0 : index
    %395 = vector.load %arg2[%c0_135, %c0_136] : memref<32x128xbf16, #tpu.memory_space<vmem>>, vector<32x128xbf16>
    %cst_137 = arith.constant dense<0.000000e+00> : vector<8x128xf32>
    %396 = tpu.matmul %394, %395, %cst_137 {dimension_numbers = #tpu.dot_dimension_numbers<[1], [0], [0], [1], [0, 0, 1, 1], [], []>} : vector<8x32xbf16>, vector<32x128xbf16>, vector<8x128xf32> -> vector<8x128xf32>
    %397 = arith.addf %393, %396 : vector<8x128xf32>
    %398 = arith.negf %397 : vector<8x128xf32>
    %399 = math.exp %398 : vector<8x128xf32>
    %cst_138 = arith.constant 1.000000e+00 : f32
    %400 = vector.broadcast %cst_138 : f32 to vector<8x128xf32>
    %401 = arith.addf %400, %399 : vector<8x128xf32>
    %402 = arith.divf %400, %401 : vector<8x128xf32>
    %403 = math.tanh %397 : vector<8x128xf32>
    %404 = vector.extract_strided_slice %402 {offsets = [0, 0], sizes = [8, 32], strides = [1, 1]} : vector<8x128xf32> to vector<8x32xf32>
    %405 = vector.extract_strided_slice %402 {offsets = [0, 32], sizes = [8, 32], strides = [1, 1]} : vector<8x128xf32> to vector<8x32xf32>
    %406 = vector.extract_strided_slice %403 {offsets = [0, 64], sizes = [8, 32], strides = [1, 1]} : vector<8x128xf32> to vector<8x32xf32>
    %407 = vector.extract_strided_slice %402 {offsets = [0, 96], sizes = [8, 32], strides = [1, 1]} : vector<8x128xf32> to vector<8x32xf32>
    %408 = arith.mulf %405, %388 : vector<8x32xf32>
    %409 = arith.mulf %404, %406 : vector<8x32xf32>
    %410 = arith.addf %408, %409 : vector<8x32xf32>
    %411 = math.tanh %410 : vector<8x32xf32>
    %412 = arith.mulf %407, %411 : vector<8x32xf32>
    %c8_i32_139 = arith.constant 8 : i32
    %413 = arith.truncf %412 : vector<8x32xf32> to vector<8x32xbf16>
    %c0_140 = arith.constant 0 : index
    %c0_141 = arith.constant 0 : index
    %414 = vector.load %arg5[%c0_140, %c0_141] : memref<32x128xbf16, #tpu.memory_space<vmem>>, vector<32x128xbf16>
    %cst_142 = arith.constant dense<0.000000e+00> : vector<8x128xf32>
    %415 = tpu.matmul %413, %414, %cst_142 {dimension_numbers = #tpu.dot_dimension_numbers<[1], [0], [0], [1], [0, 0, 1, 1], [], []>} : vector<8x32xbf16>, vector<32x128xbf16>, vector<8x128xf32> -> vector<8x128xf32>
    %c0_143 = arith.constant 0 : index
    %c0_144 = arith.constant 0 : index
    %416 = vector.load %arg6[%c0_143, %c0_144] : memref<1x128xf32, #tpu.memory_space<vmem>>, vector<1x128xf32>
    %417 = vector.broadcast %416 : vector<1x128xf32> to vector<8x128xf32>
    %418 = arith.addf %415, %417 : vector<8x128xf32>
    %c0_145 = arith.constant 0 : index
    %c0_146 = arith.constant 0 : index
    %419 = vector.load %arg7[%c0_145, %c0_146] : memref<8x128xf32, #tpu.memory_space<vmem>>, vector<8x128xf32>
    tpu.vector_store %arg7[%c0_145, %c0_146], %418 {strides = array<i32>} : memref<8x128xf32, #tpu.memory_space<vmem>>, vector<8x128xf32>,
    return
  }
}

</mosaic_0001>

<bundles_post_ra>
// kernel: lstm_sale_forward.1
= control target key start
LH: loop header
LB: loop body
LE: loop exit
PB: predicated region body
PF: predicated region fallthrough
CT: control target
= control target key end

     0   :  { %v1614_v2 = vmov 0   ;;  %s1615_s30 = smov 64   ;;  %s1616_s8 = smov 32   ;;  %vm44_vm4 = vcmask 261120   ;;  %s1941_s1 = inlined_call_operand.vmem [shape: bf16[32,128], index: 1, kind: input, shape index: {}]   ;;  %s1942_s0 = inlined_call_operand.vmem [shape: f32[8,8,128], index: 0, kind: input, shape index: {}]   ;;  %s1943_s3 = inlined_call_operand.vmem [shape: bf16[32,128], index: 3, kind: input, shape index: {}]   ;;  %s1944_s4 = inlined_call_operand.vmem [shape: f32[1,128], index: 4, kind: input, shape index: {}]   ;;  %s1945_s2 = inlined_call_operand.vmem [shape: bf16[32,128], index: 2, kind: input, shape index: {}]   ;;  %s1946_s5 = inlined_call_operand.vmem [shape: bf16[32,128], index: 5, kind: input, shape index: {}]   ;;  %s1947_s6 = inlined_call_operand.vmem [shape: f32[1,128], index: 6, kind: input, shape index: {}]   ;;  %s1948_s7 = inlined_call_operand.vmem [shape: f32[8,128], index: 7, kind: output, shape index: {}]  }
   0x1   :  { %v1456_v0 = vld [vmem:[%s1941_s1 + $0x8] sm:$0xff]  ;;  %v1455_v1 = vld [vmem:[%s1941_s1] sm:$0xff] }
   0x2   :  { %54 = vmatpush.bf16.msra.mxu0 %v1456_v0  ;;  %v27_v3 = vld [vmem:[%s1942_s0] sm:$0xff]  ;;  %v1458_v27 = vld [vmem:[%s1941_s1 + $0x8] sm:$0xff] }
   0x3   :  { %137 = vmatpush.bf16.msra.mxu1 %v1458_v27  ;;  %v1457_v28 = vld [vmem:[%s1941_s1] sm:$0xff]  ;;  %v1318_v35 = vld [vmem:[%s1942_s0 + $0x8] sm:$0xff] }
   0x4   :  { %v1460_v59 = vld [vmem:[%s1941_s1 + $0x8] sm:$0xff]  ;;  %v1459_v60 = vld [vmem:[%s1941_s1] sm:$0xff] }
   0x5   :  { %220 = vmatpush.bf16.msra.mxu2 %v1460_v59 }
   0x6   :  { %55 = vmatpush.bf16.msra.mxu0 %v1455_v1 }
   0x7   :  { %138 = vmatpush.bf16.msra.mxu1 %v1457_v28  ;;  %v1462_v28 = vld [vmem:[%s1941_s1 + $0x8] sm:$0xff] }
   0x8   :  { %303 = vmatpush.bf16.msra.mxu3 %v1462_v28 }
   0x9   :  { %56 = vmatmul.bf16.vlgmr.msra.gmra.mxu0 %v1614_v2  ;;  %221 = vmatpush.bf16.msra.mxu2 %v1459_v60 }
  0x86   :  { %v57_v4 = vpop.f32.mrf.mxu0 }
  0x87   :  { %v61_v5 = vadd.f32 %v57_v4, %v27_v3  ;;  %v1329_v4 = vld [vmem:[%s1942_s0 + $0x10] sm:$0xff] }
  0x89   :  { %1486 = vtanh.f32 %v61_v5  ;;  %v1317_v8 = vmul.f32 -1.442695, %v61_v5 }
  0x8b   :  { %1488 = vpow2.f32 %v1317_v8 }
  0x8e   :  { %v59_v6 = vpop.f32.mrf.mxu0 }
  0x8f   :  { %v1487_v7 = vpop.eup %1486 }
  0x90   :  { %84 = vrot.lane.b32.xlu0 %v1487_v7, %s1615_s30 }
  0x91   :  { %v1489_v9 = vpop.eup %1488 }
  0x92   :  { %v65_v10 = vadd.f32 1.0, %v1489_v9 }
  0x94   :  { %1490 = vrcp.f32 %v65_v10  ;;  %v77_v16 = vand.u32 2147483648, %v65_v10  ;;  %vm71_vm1 = vweird.f32 %v65_v10  ;;  %v75_v17 = vand.u32 2147483647, %v65_v10 }
  0x96   :  { %v78_v19 = vor.u32 1.1754944e-38, %v77_v16  ;;  %vm76_vm3 = vcmp.eq.f32.partialorder %v75_v17, 8.507059e+37 }
  0x9a   :  { %v1491_v11 = vpop.eup %1490 }
  0x9b   :  { %v67_v12 = vmul.f32 %v1491_v11, %v65_v10  ;;  %vm72_vm0 = vweird.f32 %v1491_v11 }
  0x9c   :  { %vm73_vm2 = vmor %vm71_vm1, %vm72_vm0 }
  0x9d   :  { %v68_v13 = vsub.f32 1.0, %v67_v12 }
  0x9f   :  { %v69_v14 = vmul.f32 %v1491_v11, %v68_v13 }
  0xa1   :  { %v70_v15 = vadd.f32 %v1491_v11, %v69_v14 }
  0xa3   :  { %v74_v18 = vsel %vm73_vm2, %v1491_v11, %v70_v15 }
  0xa4   :  { %v79_v21 = vsel %vm76_vm3, %v78_v19, %v74_v18 }
  0xa5   :  { %v82_v23 = vmul.f32 0.0, %v79_v21 }
 0x102   :  { %v85_v20 = vpop.permute.xlu0 %84 }
 0x103   :  { %v87_v22 = vmul.f32 %v85_v20, %v79_v21 }
 0x105   :  { %89 = vrot.lane.b32.xlu0 %v87_v22, %s1616_s8 }
 0x177   :  { %v90_v24 = vpop.permute.xlu0 %89 }
 0x178   :  { %v92_v25 = vadd.f32 %v90_v24, %v82_v23 }
 0x17a   :  { %1492 = vtanh.f32 %v92_v25 }
 0x180   :  { %v1493_v26 = vpop.eup %1492 }
 0x181   :  { %95 = vrot.lane.b32.xlu1 %v1493_v26, %s1615_s30 }
 0x1f3   :  { %v96_v29 = vpop.permute.xlu1 %95 }
 0x1f4   :  { %v98_v30 = vmul.f32 %v96_v29, %v79_v21  ;;  %v1461_v29 = vld [vmem:[%s1941_s1] sm:$0xff] }
 0x1f5   :  { %304 = vmatpush.bf16.msra.mxu3 %v1461_v29 }
 0x1f6   :  { %v1676_v31 = vpack.c.bf16 %v98_v30, %v98_v30 }
 0x1f8   :  { %v112_v32 = vunpack.c.l.b16 %v1676_v31 }
 0x1fa   :  { %v113_v33 = vpack.c.b16 %v112_v32, %v112_v32 }
 0x1fc   :  { %114 = vrot.lane.b32.xlu1 %v113_v33, %s1616_s8 }
 0x26e   :  { %v115_v34 = vpop.permute.xlu1 %114 }
 0x26f   :  { %1327 = vmatmul.msk.bf16.vlgmr.msra.gmra.mxu1 %vm44_vm4, %v115_v34 }
 0x2ec   :  { %v140_v36 = vpop.f32.mrf.mxu1 }
 0x2ed   :  { %v144_v37 = vadd.f32 %v1318_v35, %v140_v36 }
 0x2ef   :  { %1494 = vtanh.f32 %v144_v37  ;;  %v1328_v40 = vmul.f32 -1.442695, %v144_v37  ;;  %v1340_v37 = vld [vmem:[%s1942_s0 + $0x18] sm:$0xff] }
 0x2f1   :  { %1496 = vpow2.f32 %v1328_v40 }
 0x2f4   :  { %v142_v38 = vpop.f32.mrf.mxu1 }
 0x2f5   :  { %v1495_v39 = vpop.eup %1494 }
 0x2f6   :  { %167 = vrot.lane.b32.xlu2 %v1495_v39, %s1615_s30 }
 0x2f7   :  { %v1497_v41 = vpop.eup %1496 }
 0x2f8   :  { %v148_v42 = vadd.f32 1.0, %v1497_v41 }
 0x2fa   :  { %1498 = vrcp.f32 %v148_v42  ;;  %v160_v48 = vand.u32 2147483648, %v148_v42  ;;  %vm154_vm6 = vweird.f32 %v148_v42  ;;  %v158_v49 = vand.u32 2147483647, %v148_v42 }
 0x2fc   :  { %v161_v51 = vor.u32 1.1754944e-38, %v160_v48  ;;  %vm159_vm8 = vcmp.eq.f32.partialorder %v158_v49, 8.507059e+37 }
 0x300   :  { %v1499_v43 = vpop.eup %1498 }
 0x301   :  { %v150_v44 = vmul.f32 %v1499_v43, %v148_v42  ;;  %vm155_vm5 = vweird.f32 %v1499_v43 }
 0x302   :  { %vm156_vm7 = vmor %vm154_vm6, %vm155_vm5  ;;  %vm104_vm6 = vcmask 257024  }
 0x303   :  { %v151_v45 = vsub.f32 1.0, %v150_v44 }
 0x305   :  { %v152_v46 = vmul.f32 %v1499_v43, %v151_v45 }
 0x307   :  { %v153_v47 = vadd.f32 %v1499_v43, %v152_v46 }
 0x309   :  { %v157_v50 = vsel %vm156_vm7, %v1499_v43, %v153_v47 }
 0x30a   :  { %v162_v53 = vsel %vm159_vm8, %v161_v51, %v157_v50 }
 0x30b   :  { %v165_v55 = vmul.f32 %v162_v53, %v92_v25 }
 0x350   :  { %v168_v52 = vpop.permute.xlu2 %167 }
 0x351   :  { %v170_v54 = vmul.f32 %v168_v52, %v162_v53 }
 0x353   :  { %172 = vrot.lane.b32.xlu2 %v170_v54, %s1616_s8 }
 0x3ad   :  { %v173_v56 = vpop.permute.xlu2 %172 }
 0x3ae   :  { %v175_v57 = vadd.f32 %v173_v56, %v165_v55 }
 0x3b0   :  { %1500 = vtanh.f32 %v175_v57 }
 0x3b6   :  { %v1501_v58 = vpop.eup %1500 }
 0x3b7   :  { %178 = vrot.lane.b32.xlu0 %v1501_v58, %s1615_s30 }
 0x429   :  { %v179_v61 = vpop.permute.xlu0 %178 }
 0x42a   :  { %v181_v62 = vmul.f32 %v179_v61, %v162_v53  ;;  %v1464_v61 = vld [vmem:[%s1941_s1 + $0x8] sm:$0xff] }
 0x42b   :  { %386 = vmatpush.bf16.msrb.mxu0 %v1464_v61 }
 0x42c   :  { %v1693_v63 = vpack.c.bf16 %v181_v62, %v181_v62  ;;  %v1463_v62 = vld [vmem:[%s1941_s1] sm:$0xff] }
 0x42e   :  { %v195_v0 = vunpack.c.l.b16 %v1693_v63 }
 0x42f   :  { %387 = vmatpush.bf16.msrb.mxu0 %v1463_v62 }
 0x430   :  { %v196_v1 = vpack.c.b16 %v195_v0, %v195_v0 }
 0x432   :  { %197 = vrot.lane.b32.xlu1 %v196_v1, %s1616_s8 }
 0x4a4   :  { %v198_v3 = vpop.permute.xlu1 %197 }
 0x4a5   :  { %1338 = vmatmul.msk.bf16.vlgmr.msra.gmra.mxu2 %vm44_vm4, %v198_v3 }
 0x528   :  { %v223_v5 = vpop.f32.mrf.mxu2 }
 0x529   :  { %v227_v6 = vadd.f32 %v1329_v4, %v223_v5 }
 0x52b   :  { %1502 = vtanh.f32 %v227_v6  ;;  %v1339_v9 = vmul.f32 -1.442695, %v227_v6 }
 0x52d   :  { %1504 = vpow2.f32 %v1339_v9 }
 0x530   :  { %v225_v7 = vpop.f32.mrf.mxu2 }
 0x531   :  { %v1503_v8 = vpop.eup %1502  ;;  %v1351_v7 = vld [vmem:[%s1942_s0 + $0x20] sm:$0xff] }
 0x532   :  { %250 = vrot.lane.b32.xlu2 %v1503_v8, %s1615_s30 }
 0x533   :  { %v1505_v10 = vpop.eup %1504 }
 0x534   :  { %v231_v11 = vadd.f32 1.0, %v1505_v10 }
 0x536   :  { %1506 = vrcp.f32 %v231_v11  ;;  %v243_v17 = vand.u32 2147483648, %v231_v11  ;;  %vm237_vm10 = vweird.f32 %v231_v11  ;;  %v241_v18 = vand.u32 2147483647, %v231_v11 }
 0x538   :  { %v244_v20 = vor.u32 1.1754944e-38, %v243_v17  ;;  %vm242_vm12 = vcmp.eq.f32.partialorder %v241_v18, 8.507059e+37 }
 0x53c   :  { %v1507_v12 = vpop.eup %1506 }
 0x53d   :  { %v233_v13 = vmul.f32 %v1507_v12, %v231_v11  ;;  %vm238_vm9 = vweird.f32 %v1507_v12 }
 0x53e   :  { %vm239_vm11 = vmor %vm237_vm10, %vm238_vm9 }
 0x53f   :  { %v234_v14 = vsub.f32 1.0, %v233_v13 }
 0x541   :  { %v235_v15 = vmul.f32 %v1507_v12, %v234_v14 }
 0x543   :  { %v236_v16 = vadd.f32 %v1507_v12, %v235_v15 }
 0x545   :  { %v240_v19 = vsel %vm239_vm11, %v1507_v12, %v236_v16 }
 0x546   :  { %v245_v22 = vsel %vm242_vm12, %v244_v20, %v240_v19 }
 0x547   :  { %v248_v24 = vmul.f32 %v245_v22, %v175_v57 }
 0x58c   :  { %v251_v21 = vpop.permute.xlu2 %250 }
 0x58d   :  { %v253_v23 = vmul.f32 %v251_v21, %v245_v22 }
 0x58f   :  { %255 = vrot.lane.b32.xlu0 %v253_v23, %s1616_s8 }
 0x601   :  { %v256_v25 = vpop.permute.xlu0 %255 }
 0x602   :  { %v258_v26 = vadd.f32 %v256_v25, %v248_v24 }
 0x604   :  { %1508 = vtanh.f32 %v258_v26 }
 0x60a   :  { %v1509_v27 = vpop.eup %1508 }
 0x60b   :  { %261 = vrot.lane.b32.xlu1 %v1509_v27, %s1615_s30 }
 0x67d   :  { %v262_v30 = vpop.permute.xlu1 %261 }
 0x67e   :  { %v264_v32 = vmul.f32 %v262_v30, %v245_v22 }
 0x680   :  { %v1710_v33 = vpack.c.bf16 %v264_v32, %v264_v32 }
 0x682   :  { %v278_v34 = vunpack.c.l.b16 %v1710_v33 }
 0x684   :  { %v279_v35 = vpack.c.b16 %v278_v34, %v278_v34  ;;  %v1475_v34 = vld [vmem:[%s1943_s3] sm:$0xff] }
 0x686   :  { %280 = vrot.lane.b32.xlu2 %v279_v35, %s1616_s8  ;;  %v1466_v35 = vld [vmem:[%s1941_s1 + $0x8] sm:$0xff] }
 0x687   :  { %469 = vmatpush.bf16.msrb.mxu1 %v1466_v35 }
 0x6e0   :  { %v281_v36 = vpop.permute.xlu2 %280 }
 0x6e1   :  { %1349 = vmatmul.msk.bf16.vlgmr.msra.gmra.mxu3 %vm44_vm4, %v281_v36  ;;  %v1465_v36 = vld [vmem:[%s1941_s1] sm:$0xff] }
 0x6e2   :  { %470 = vmatpush.bf16.msrb.mxu1 %v1465_v36  ;;  %v1468_v36 = vld [vmem:[%s1941_s1 + $0x8] sm:$0xff] }
 0x6e3   :  { %552 = vmatpush.bf16.msrb.mxu2 %v1468_v36 }
 0x764   :  { %v306_v38 = vpop.f32.mrf.mxu3 }
 0x765   :  { %v310_v39 = vadd.f32 %v1340_v37, %v306_v38 }
 0x767   :  { %1510 = vtanh.f32 %v310_v39  ;;  %v1350_v42 = vmul.f32 -1.442695, %v310_v39 }
 0x769   :  { %1512 = vpow2.f32 %v1350_v42 }
 0x76c   :  { %v308_v40 = vpop.f32.mrf.mxu3 }
 0x76d   :  { %v1511_v41 = vpop.eup %1510 }
 0x76e   :  { %333 = vrot.lane.b32.xlu0 %v1511_v41, %s1615_s30 }
 0x76f   :  { %v1513_v43 = vpop.eup %1512 }
 0x770   :  { %v314_v44 = vadd.f32 1.0, %v1513_v43  ;;  %v1767_v43 = vld [vmem:[%s1945_s2 + $0x8] sm:$0xff] }
 0x771   :  { %799 = vmatpush.bf16.msra.mxu1 %v1767_v43 }
 0x772   :  { %1514 = vrcp.f32 %v314_v44  ;;  %v326_v50 = vand.u32 2147483648, %v314_v44  ;;  %vm320_vm14 = vweird.f32 %v314_v44  ;;  %v324_v51 = vand.u32 2147483647, %v314_v44 }
 0x774   :  { %v327_v53 = vor.u32 1.1754944e-38, %v326_v50  ;;  %vm325_vm0 = vcmp.eq.f32.partialorder %v324_v51, 8.507059e+37  ;;  %v1789_v51 = vld [vmem:[%s1944_s4] ss:$0 sm:$0xff] }
 0x778   :  { %v1515_v45 = vpop.eup %1514 }
 0x779   :  { %v316_v46 = vmul.f32 %v1515_v45, %v314_v44  ;;  %vm321_vm13 = vweird.f32 %v1515_v45  ;;  %v1773_v44 = vld [vmem:[%s1945_s2] sm:$0xff] }
 0x77a   :  { %vm322_vm15 = vmor %vm320_vm14, %vm321_vm13  ;;  %800 = vmatpush.bf16.msra.mxu1 %v1773_v44 }
 0x77b   :  { %v317_v47 = vsub.f32 1.0, %v316_v46  ;;  %v1362_v46 = vld [vmem:[%s1942_s0 + $0x28] sm:$0xff] }
 0x77d   :  { %v318_v48 = vmul.f32 %v1515_v45, %v317_v47 }
 0x77f   :  { %v319_v49 = vadd.f32 %v1515_v45, %v318_v48 }
 0x781   :  { %v323_v52 = vsel %vm322_vm15, %v1515_v45, %v319_v49 }
 0x782   :  { %v328_v55 = vsel %vm325_vm0, %v327_v53, %v323_v52 }
 0x783   :  { %v331_v57 = vmul.f32 %v328_v55, %v258_v26 }
 0x7e0   :  { %v334_v54 = vpop.permute.xlu0 %333 }
 0x7e1   :  { %v336_v56 = vmul.f32 %v334_v54, %v328_v55 }
 0x7e3   :  { %338 = vrot.lane.b32.xlu1 %v336_v56, %s1616_s8 }
 0x855   :  { %v339_v58 = vpop.permute.xlu1 %338 }
 0x856   :  { %v341_v59 = vadd.f32 %v339_v58, %v331_v57 }
 0x858   :  { %1516 = vtanh.f32 %v341_v59 }
 0x85e   :  { %v1517_v60 = vpop.eup %1516 }
 0x85f   :  { %344 = vrot.lane.b32.xlu2 %v1517_v60, %s1615_s30 }
 0x8b9   :  { %v345_v0 = vpop.permute.xlu2 %344 }
 0x8ba   :  { %v347_v1 = vmul.f32 %v345_v0, %v328_v55 }
 0x8bc   :  { %v1727_v3 = vpack.c.bf16 %v347_v1, %v347_v1 }
 0x8be   :  { %v361_v4 = vunpack.c.l.b16 %v1727_v3 }
 0x8c0   :  { %v362_v5 = vpack.c.b16 %v361_v4, %v361_v4 }
 0x8c2   :  { %363 = vrot.lane.b32.xlu0 %v362_v5, %s1616_s8 }
 0x934   :  { %v364_v6 = vpop.permute.xlu0 %363 }
 0x935   :  { %1360 = vmatmul.msk.bf16.vlgmr.msrb.gmra.mxu0 %vm44_vm4, %v364_v6 }
 0x9b2   :  { %v389_v8 = vpop.f32.mrf.mxu0 }
 0x9b3   :  { %v393_v9 = vadd.f32 %v1351_v7, %v389_v8 }
 0x9b5   :  { %1518 = vtanh.f32 %v393_v9  ;;  %v1361_v12 = vmul.f32 -1.442695, %v393_v9 }
 0x9b7   :  { %1520 = vpow2.f32 %v1361_v12 }
 0x9ba   :  { %v391_v10 = vpop.f32.mrf.mxu0 }
 0x9bb   :  { %v1519_v11 = vpop.eup %1518 }
 0x9bc   :  { %416 = vrot.lane.b32.xlu1 %v1519_v11, %s1615_s30 }
 0x9bd   :  { %v1521_v13 = vpop.eup %1520 }
 0x9be   :  { %v397_v14 = vadd.f32 1.0, %v1521_v13 }
 0x9c0   :  { %1522 = vrcp.f32 %v397_v14  ;;  %v409_v20 = vand.u32 2147483648, %v397_v14  ;;  %vm403_vm2 = vweird.f32 %v397_v14  ;;  %v407_v21 = vand.u32 2147483647, %v397_v14 }
 0x9c2   :  { %v410_v23 = vor.u32 1.1754944e-38, %v409_v20  ;;  %vm408_vm5 = vcmp.eq.f32.partialorder %v407_v21, 8.507059e+37 }
 0x9c6   :  { %v1523_v15 = vpop.eup %1522 }
 0x9c7   :  { %v399_v16 = vmul.f32 %v1523_v15, %v397_v14  ;;  %vm404_vm1 = vweird.f32 %v1523_v15 }
 0x9c8   :  { %vm405_vm3 = vmor %vm403_vm2, %vm404_vm1 }
 0x9c9   :  { %v400_v17 = vsub.f32 1.0, %v399_v16 }
 0x9cb   :  { %v401_v18 = vmul.f32 %v1523_v15, %v400_v17 }
 0x9cd   :  { %v402_v19 = vadd.f32 %v1523_v15, %v401_v18 }
 0x9cf   :  { %v406_v22 = vsel %vm405_vm3, %v1523_v15, %v402_v19 }
 0x9d0   :  { %v411_v25 = vsel %vm408_vm5, %v410_v23, %v406_v22 }
 0x9d1   :  { %v414_v27 = vmul.f32 %v411_v25, %v341_v59 }
 0xa2e   :  { %v417_v24 = vpop.permute.xlu1 %416 }
 0xa2f   :  { %v419_v26 = vmul.f32 %v417_v24, %v411_v25 }
 0xa31   :  { %421 = vrot.lane.b32.xlu2 %v419_v26, %s1616_s8 }
 0xa39   :  { %101 = vrot.lane.b32.xlu2 %v1676_v31, %s1616_s8  ;;  %v1476_v31 = vld [vmem:[%s1943_s3 + $0x8] sm:$0xff] }
 0xa3a   :  { %745 = vmatpush.bf16.msra.mxu0 %v1476_v31 }
 0xa3e   :  { %746 = vmatpush.bf16.msra.mxu0 %v1475_v34 }
 0xa8b   :  { %v422_v28 = vpop.permute.xlu2 %421 }
 0xa8c   :  { %v1739_v29 = vadd.f32 %v422_v28, %v414_v27 }
 0xa8e   :  { %1524 = vtanh.f32 %v1739_v29 }
 0xa93   :  { %v102_v30 = vpop.permute.xlu2 %101 }
 0xa94   :  { %v1525_v32 = vpop.eup %1524  ;;  %105 = vst.msk [vmem:[#allocation3] sm:$0xf] %vm104_vm6, %v102_v30 }
 0xa95   :  { %427 = vrot.lane.b32.xlu0 %v1525_v32, %s1615_s30 }
 0xa9d   :  { %184 = vrot.lane.b32.xlu0 %v1693_v63, %s1616_s8 }
 0xb07   :  { %v428_v63 = vpop.permute.xlu0 %427 }
 0xb08   :  { %v430_v37 = vmul.f32 %v428_v63, %v411_v25 }
 0xb0a   :  { %v1758_v38 = vpack.c.bf16 %v430_v37, %v430_v37 }
 0xb0c   :  { %v444_v39 = vunpack.c.l.b16 %v1758_v38 }
 0xb0e   :  { %v445_v40 = vpack.c.b16 %v444_v39, %v444_v39 }
 0xb0f   :  { %v185_v41 = vpop.permute.xlu0 %184 }
 0xb10   :  { %188 = vst.msk [vmem:[#allocation3 + $0x4] sm:$0xf] %vm104_vm6, %v185_v41  ;;  %446 = vrot.lane.b32.xlu1 %v445_v40, %s1616_s8 }
 0xb17   :  { %v1471_v42 = vld [vmem:[#allocation3] sm:$0xff] }
 0xb18   :  { %1419 = vmatmul.msk.bf16.vlgmr.msra.gmra.mxu0 %vm44_vm4, %v1471_v42 }
 0xb82   :  { %v447_v45 = vpop.permute.xlu1 %446 }
 0xb83   :  { %1371 = vmatmul.msk.bf16.vlgmr.msrb.gmra.mxu1 %vm44_vm4, %v447_v45 }
 0xb84   :  { %979 = vmatpush.bf16.msrb.mxu1 %v1767_v43 }
 0xb88   :  { %980 = vmatpush.bf16.msrb.mxu1 %v1773_v44 }
 0xb93   :  { %801 = vmatmul.bf16.vlgmr.msra.gmra.mxu1 %v1614_v2 }
 0xb94   :  { %1159 = vmatpush.bf16.msra.mxu1 %v1767_v43 }
 0xb95   :  { %v748_v2 = vpop.f32.mrf.mxu0 }
 0xb96   :  { %v749_v52 = vadd.f32 %v1789_v51, %v748_v2 }
 0xb98   :  { %1160 = vmatpush.bf16.msra.mxu1 %v1773_v44 }
 0xc00   :  { %v472_v47 = vpop.f32.mrf.mxu1 }
 0xc01   :  { %v476_v48 = vadd.f32 %v1362_v46, %v472_v47  ;;  %v1467_v46 = vld [vmem:[%s1941_s1] sm:$0xff] }
 0xc02   :  { %553 = vmatpush.bf16.msrb.mxu2 %v1467_v46 }
 0xc03   :  { %1526 = vtanh.f32 %v476_v48  ;;  %v1372_v58 = vmul.f32 -1.442695, %v476_v48 }
 0xc06   :  { %859 = vmatpush.bf16.msra.mxu2 %v1767_v43 }
 0xc08   :  { %v474_v49 = vpop.f32.mrf.mxu1 }
 0xc09   :  { %v1527_v50 = vpop.eup %1526  ;;  %v1373_v49 = vld [vmem:[%s1942_s0 + $0x30] sm:$0xff] }
 0xc0a   :  { %499 = vrot.lane.b32.xlu1 %v1527_v50, %s1615_s30  ;;  %860 = vmatpush.bf16.msra.mxu2 %v1773_v44 }
 0xc10   :  { %v802_v53 = vpop.f32.mrf.mxu1 }
 0xc11   :  { %v806_v54 = vadd.f32 %v802_v53, %v749_v52 }
 0xc13   :  { %1528 = vtanh.f32 %v806_v54  ;;  %v1431_v57 = vmul.f32 -1.442695, %v806_v54  ;;  %v750_v54 = vpop.f32.mrf.mxu0 }
 0xc15   :  { %1530 = vpow2.f32 %v1431_v57 }
 0xc16   :  { %1532 = vpow2.f32 %v1372_v58 }
 0xc18   :  { %v804_v55 = vpop.f32.mrf.mxu1 }
 0xc19   :  { %v1529_v56 = vpop.eup %1528  ;;  %v751_v55 = vadd.f32 %v1789_v51, %v750_v54 }
 0xc1a   :  { %829 = vrot.lane.b32.xlu2 %v1529_v56, %s1615_s30 }
 0xc1b   :  { %v1531_v59 = vpop.eup %1530 }
 0xc1c   :  { %v810_v60 = vadd.f32 1.0, %v1531_v59  ;;  %v1533_v61 = vpop.eup %1532 }
 0xc1d   :  { %v480_v62 = vadd.f32 1.0, %v1533_v61 }
 0xc1e   :  { %1534 = vrcp.f32 %v810_v60  ;;  %v822_v10 = vand.u32 2147483648, %v810_v60  ;;  %vm816_vm8 = vweird.f32 %v810_v60  ;;  %v820_v11 = vand.u32 2147483647, %v810_v60 }
 0xc1f   :  { %1536 = vrcp.f32 %v480_v62  ;;  %v492_v19 = vand.u32 2147483648, %v480_v62  ;;  %vm486_vm12 = vweird.f32 %v480_v62  ;;  %v490_v20 = vand.u32 2147483647, %v480_v62 }
 0xc20   :  { %v823_v14 = vor.u32 1.1754944e-38, %v822_v10  ;;  %vm821_vm10 = vcmp.eq.f32.partialorder %v820_v11, 8.507059e+37 }
 0xc21   :  { %v493_v22 = vor.u32 1.1754944e-38, %v492_v19  ;;  %vm491_vm14 = vcmp.eq.f32.partialorder %v490_v20, 8.507059e+37 }
 0xc24   :  { %v1535_v0 = vpop.eup %1534 }
 0xc25   :  { %v812_v1 = vmul.f32 %v1535_v0, %v810_v60  ;;  %v1537_v5 = vpop.eup %1536  ;;  %vm817_vm7 = vweird.f32 %v1535_v0 }
 0xc26   :  { %v482_v7 = vmul.f32 %v1537_v5, %v480_v62  ;;  %vm818_vm9 = vmor %vm816_vm8, %vm817_vm7  ;;  %vm487_vm11 = vweird.f32 %v1537_v5 }
 0xc27   :  { %v813_v4 = vsub.f32 1.0, %v812_v1  ;;  %vm488_vm13 = vmor %vm486_vm12, %vm487_vm11 }
 0xc28   :  { %v483_v9 = vsub.f32 1.0, %v482_v7 }
 0xc29   :  { %v814_v6 = vmul.f32 %v1535_v0, %v813_v4 }
 0xc2a   :  { %v484_v13 = vmul.f32 %v1537_v5, %v483_v9 }
 0xc2b   :  { %v815_v8 = vadd.f32 %v1535_v0, %v814_v6 }
 0xc2c   :  { %v485_v18 = vadd.f32 %v1537_v5, %v484_v13 }
 0xc2d   :  { %v819_v12 = vsel %vm818_vm9, %v1535_v0, %v815_v8 }
 0xc2e   :  { %v824_v16 = vsel %vm821_vm10, %v823_v14, %v819_v12  ;;  %v489_v21 = vsel %vm488_vm13, %v1537_v5, %v485_v18 }
 0xc2f   :  { %v494_v24 = vsel %vm491_vm14, %v493_v22, %v489_v21  ;;  %v827_v26 = vmul.f32 0.0, %v824_v16 }
 0xc30   :  { %v497_v30 = vmul.f32 %v494_v24, %v1739_v29 }
 0xc74   :  { %v830_v15 = vpop.permute.xlu2 %829 }
 0xc75   :  { %v832_v17 = vmul.f32 %v830_v15, %v824_v16 }
 0xc77   :  { %834 = vrot.lane.b32.xlu1 %v832_v17, %s1616_s8 }
 0xc7c   :  { %v500_v23 = vpop.permute.xlu1 %499 }
 0xc7d   :  { %v502_v25 = vmul.f32 %v500_v23, %v494_v24 }
 0xc7f   :  { %504 = vrot.lane.b32.xlu0 %v502_v25, %s1616_s8 }
 0xce9   :  { %v835_v27 = vpop.permute.xlu1 %834 }
 0xcea   :  { %v1795_v28 = vadd.f32 %v835_v27, %v827_v26 }
 0xcec   :  { %1538 = vtanh.f32 %v1795_v28 }
 0xcf1   :  { %v505_v32 = vpop.permute.xlu0 %504 }
 0xcf2   :  { %v1539_v31 = vpop.eup %1538  ;;  %v1799_v34 = vadd.f32 %v505_v32, %v497_v30 }
 0xcf3   :  { %840 = vrot.lane.b32.xlu0 %v1539_v31, %s1615_s30 }
 0xcf4   :  { %1540 = vtanh.f32 %v1799_v34 }
 0xcfa   :  { %v1541_v35 = vpop.eup %1540 }
 0xcfb   :  { %510 = vrot.lane.b32.xlu2 %v1541_v35, %s1615_s30 }
 0xd55   :  { %v511_v63 = vpop.permute.xlu2 %510 }
 0xd56   :  { %v513_v37 = vmul.f32 %v511_v63, %v494_v24 }
 0xd58   :  { %v1807_v39 = vpack.c.bf16 %v513_v37, %v513_v37 }
 0xd5a   :  { %v527_v29 = vunpack.c.l.b16 %v1807_v39 }
 0xd5c   :  { %v528_v40 = vpack.c.b16 %v527_v29, %v527_v29 }
 0xd5e   :  { %529 = vrot.lane.b32.xlu1 %v528_v40, %s1616_s8 }
 0xd65   :  { %v841_v41 = vpop.permute.xlu0 %840 }
 0xd66   :  { %v843_v42 = vmul.f32 %v841_v41, %v824_v16 }
 0xd68   :  { %v846_v45 = vpack.c.bf16 %v843_v42, %v843_v42  ;;  %v1470_v42 = vld [vmem:[%s1941_s1 + $0x8] sm:$0xff] }
 0xd69   :  { %635 = vmatpush.bf16.msrb.mxu3 %v1470_v42 }
 0xd6a   :  { %848 = vrot.lane.b32.xlu2 %v846_v45, %s1616_s8 }
 0xdc4   :  { %v849_v48 = vpop.permute.xlu2 %848 }
 0xdd0   :  { %v530_v47 = vpop.permute.xlu1 %529 }
 0xdd1   :  { %1382 = vmatmul.msk.bf16.vlgmr.msrb.gmra.mxu2 %vm44_vm4, %v530_v47 }
 0xdd2   :  { %1039 = vmatpush.bf16.msrb.mxu2 %v1767_v43 }
 0xdd6   :  { %1040 = vmatpush.bf16.msrb.mxu2 %v1773_v44 }
 0xde1   :  { %1432 = vmatmul.msk.bf16.vlgmr.msra.gmra.mxu2 %vm44_vm4, %v849_v48 }
 0xde2   :  { %1219 = vmatpush.bf16.msra.mxu2 %v1767_v43 }
 0xde6   :  { %1220 = vmatpush.bf16.msra.mxu2 %v1773_v44 }
 0xe54   :  { %v555_v50 = vpop.f32.mrf.mxu2 }
 0xe55   :  { %v559_v2 = vadd.f32 %v1373_v49, %v555_v50 }
 0xe57   :  { %1542 = vtanh.f32 %v559_v2  ;;  %v1383_v60 = vmul.f32 -1.442695, %v559_v2 }
 0xe5c   :  { %v557_v52 = vpop.f32.mrf.mxu2 }
 0xe5d   :  { %v1543_v53 = vpop.eup %1542 }
 0xe5e   :  { %582 = vrot.lane.b32.xlu0 %v1543_v53, %s1615_s30 }
 0xe64   :  { %v862_v56 = vpop.f32.mrf.mxu2 }
 0xe65   :  { %v866_v57 = vadd.f32 %v862_v56, %v751_v55 }
 0xe67   :  { %1544 = vtanh.f32 %v866_v57  ;;  %v1433_v0 = vmul.f32 -1.442695, %v866_v57 }
 0xe68   :  { %1546 = vpow2.f32 %v1383_v60 }
 0xe6c   :  { %v864_v58 = vpop.f32.mrf.mxu2 }
 0xe6d   :  { %v1545_v59 = vpop.eup %1544 }
 0xe6e   :  { %889 = vrot.lane.b32.xlu1 %v1545_v59, %s1615_s30  ;;  %v1547_v61 = vpop.eup %1546 }
 0xe6f   :  { %v563_v62 = vadd.f32 1.0, %v1547_v61 }
 0xe71   :  { %1548 = vrcp.f32 %v563_v62  ;;  %v575_v11 = vand.u32 2147483648, %v563_v62  ;;  %vm569_vm0 = vweird.f32 %v563_v62  ;;  %v573_v12 = vand.u32 2147483647, %v563_v62 }
 0xe72   :  { %1550 = vpow2.f32 %v1433_v0 }
 0xe73   :  { %v576_v15 = vor.u32 1.1754944e-38, %v575_v11  ;;  %vm574_vm2 = vcmp.eq.f32.partialorder %v573_v12, 8.507059e+37 }
 0xe77   :  { %v1549_v1 = vpop.eup %1548 }
 0xe78   :  { %v1551_v4 = vpop.eup %1550  ;;  %v565_v5 = vmul.f32 %v1549_v1, %v563_v62  ;;  %vm570_vm15 = vweird.f32 %v1549_v1 }
 0xe79   :  { %v870_v6 = vadd.f32 1.0, %v1551_v4  ;;  %vm571_vm1 = vmor %vm569_vm0, %vm570_vm15 }
 0xe7a   :  { %v566_v7 = vsub.f32 1.0, %v565_v5 }
 0xe7b   :  { %1552 = vrcp.f32 %v870_v6  ;;  %v882_v22 = vand.u32 2147483648, %v870_v6  ;;  %vm876_vm5 = vweird.f32 %v870_v6  ;;  %v880_v23 = vand.u32 2147483647, %v870_v6 }
 0xe7c   :  { %v567_v8 = vmul.f32 %v1549_v1, %v566_v7 }
 0xe7d   :  { %v883_v25 = vor.u32 1.1754944e-38, %v882_v22  ;;  %vm881_vm8 = vcmp.eq.f32.partialorder %v880_v23, 8.507059e+37 }
 0xe7e   :  { %v568_v9 = vadd.f32 %v1549_v1, %v567_v8 }
 0xe80   :  { %v572_v13 = vsel %vm571_vm1, %v1549_v1, %v568_v9 }
 0xe81   :  { %v1553_v10 = vpop.eup %1552  ;;  %v577_v16 = vsel %vm574_vm2, %v576_v15, %v572_v13 }
 0xe82   :  { %v872_v14 = vmul.f32 %v1553_v10, %v870_v6  ;;  %vm877_vm3 = vweird.f32 %v1553_v10  ;;  %v580_v32 = vmul.f32 %v577_v16, %v1799_v34 }
 0xe83   :  { %vm878_vm7 = vmor %vm876_vm5, %vm877_vm3 }
 0xe84   :  { %v873_v19 = vsub.f32 1.0, %v872_v14 }
 0xe86   :  { %v874_v20 = vmul.f32 %v1553_v10, %v873_v19 }
 0xe88   :  { %v875_v21 = vadd.f32 %v1553_v10, %v874_v20 }
 0xe8a   :  { %v879_v24 = vsel %vm878_vm7, %v1553_v10, %v875_v21 }
 0xe8b   :  { %v884_v27 = vsel %vm881_vm8, %v883_v25, %v879_v24 }
 0xe8c   :  { %v887_v63 = vmul.f32 %v884_v27, %v1795_v28  ;;  %v1469_v28 = vld [vmem:[%s1941_s1] sm:$0xff] }
 0xe8d   :  { %636 = vmatpush.bf16.msrb.mxu3 %v1469_v28 }
 0xe91   :  { %919 = vmatpush.bf16.msra.mxu3 %v1767_v43 }
 0xe95   :  { %920 = vmatpush.bf16.msra.mxu3 %v1773_v44 }
 0xed0   :  { %v583_v17 = vpop.permute.xlu0 %582 }
 0xed1   :  { %v585_v18 = vmul.f32 %v583_v17, %v577_v16 }
 0xed3   :  { %587 = vrot.lane.b32.xlu2 %v585_v18, %s1616_s8 }
 0xee0   :  { %v890_v26 = vpop.permute.xlu1 %889 }
 0xee1   :  { %v892_v30 = vmul.f32 %v890_v26, %v884_v27 }
 0xee3   :  { %894 = vrot.lane.b32.xlu0 %v892_v30, %s1616_s8 }
 0xf2d   :  { %v588_v31 = vpop.permute.xlu2 %587 }
 0xf2e   :  { %v1832_v35 = vadd.f32 %v588_v31, %v580_v32 }
 0xf30   :  { %1554 = vtanh.f32 %v1832_v35 }
 0xf36   :  { %v1555_v36 = vpop.eup %1554 }
 0xf37   :  { %593 = vrot.lane.b32.xlu1 %v1555_v36, %s1615_s30 }
 0xf3f   :  { %267 = vrot.lane.b32.xlu1 %v1710_v33, %s1616_s8 }
 0xf55   :  { %v895_v37 = vpop.permute.xlu0 %894 }
 0xf56   :  { %v1839_v29 = vadd.f32 %v895_v37, %v887_v63 }
 0xf58   :  { %1556 = vtanh.f32 %v1839_v29 }
 0xf5e   :  { %v1557_v40 = vpop.eup %1556 }
 0xf5f   :  { %900 = vrot.lane.b32.xlu2 %v1557_v40, %s1615_s30 }
 0xf67   :  { %350 = vrot.lane.b32.xlu2 %v1727_v3, %s1616_s8 }
 0xfa9   :  { %v594_v34 = vpop.permute.xlu1 %593 }
 0xfaa   :  { %v596_v41 = vmul.f32 %v594_v34, %v577_v16 }
 0xfac   :  { %v1848_v33 = vpack.c.bf16 %v596_v41, %v596_v41 }
 0xfae   :  { %v610_v45 = vunpack.c.l.b16 %v1848_v33 }
 0xfb0   :  { %v611_v46 = vpack.c.b16 %v610_v45, %v610_v45 }
 0xfb1   :  { %v268_v47 = vpop.permute.xlu1 %267 }
 0xfb2   :  { %271 = vst.msk [vmem:[#allocation3 + $0x8] sm:$0xf] %vm104_vm6, %v268_v47  ;;  %612 = vrot.lane.b32.xlu0 %v611_v46, %s1616_s8 }
 0xfb9   :  { %v901_v3 = vpop.permute.xlu2 %900 }
 0xfba   :  { %v903_v48 = vmul.f32 %v901_v3, %v884_v27 }
 0xfbc   :  { %v906_v49 = vpack.c.bf16 %v903_v48, %v903_v48 }
 0xfbe   :  { %908 = vrot.lane.b32.xlu0 %v906_v49, %s1616_s8 }
 0xfc1   :  { %v351_v50 = vpop.permute.xlu2 %350 }
 0xfc2   :  { %354 = vst.msk [vmem:[#allocation3 + $0xc] sm:$0xf] %vm104_vm6, %v351_v50 }
 0xfc9   :  { %v1472_v2 = vld [vmem:[#allocation3 + $0x8] sm:$0xff] }
 0xfca   :  { %1420 = vmatmul.msk.bf16.gmra.mxu0 %vm44_vm4, %v1472_v2 }
0x1024   :  { %v613_v52 = vpop.permute.xlu0 %612 }
0x1025   :  { %1393 = vmatmul.msk.bf16.vlgmr.msrb.gmra.mxu3 %vm44_vm4, %v613_v52 }
0x1026   :  { %1099 = vmatpush.bf16.msrb.mxu3 %v1767_v43 }
0x102a   :  { %1100 = vmatpush.bf16.msrb.mxu3 %v1773_v44 }
0x1030   :  { %v909_v53 = vpop.permute.xlu0 %908 }
0x1035   :  { %1434 = vmatmul.msk.bf16.vlgmr.msra.gmra.mxu3 %vm44_vm4, %v909_v53 }
0x1047   :  { %v753_v56 = vpop.f32.mrf.mxu0 }
0x1048   :  { %v754_v57 = vadd.f32 %v1789_v51, %v753_v56 }
0x104f   :  { %v755_v22 = vpop.f32.mrf.mxu0 }
0x1050   :  { %v756_v23 = vadd.f32 %v1789_v51, %v755_v22 }
0x10a8   :  { %v1865_v54 = vpop.f32.mrf.mxu3 }
0x10b0   :  { %v640_v55 = vpop.f32.mrf.mxu3 }
0x10b8   :  { %v922_v58 = vpop.f32.mrf.mxu3 }
0x10b9   :  { %v926_v59 = vadd.f32 %v922_v58, %v754_v57 }
0x10bb   :  { %1558 = vtanh.f32 %v926_v59  ;;  %v1435_v62 = vmul.f32 -1.442695, %v926_v59 }
0x10bd   :  { %1560 = vpow2.f32 %v1435_v62 }
0x10c0   :  { %v924_v60 = vpop.f32.mrf.mxu3 }
0x10c1   :  { %v1559_v61 = vpop.eup %1558 }
0x10c2   :  { %949 = vrot.lane.b32.xlu1 %v1559_v61, %s1615_s30 }
0x10c3   :  { %v1561_v43 = vpop.eup %1560 }
0x10c4   :  { %v930_v44 = vadd.f32 1.0, %v1561_v43 }
0x10c6   :  { %1562 = vrcp.f32 %v930_v44  ;;  %v942_v7 = vand.u32 2147483648, %v930_v44  ;;  %vm936_vm10 = vweird.f32 %v930_v44  ;;  %v940_v8 = vand.u32 2147483647, %v930_v44 }
0x10c8   :  { %v943_v10 = vor.u32 1.1754944e-38, %v942_v7  ;;  %vm941_vm12 = vcmp.eq.f32.partialorder %v940_v8, 8.507059e+37 }
0x10cc   :  { %v1563_v0 = vpop.eup %1562 }
0x10cd   :  { %v932_v1 = vmul.f32 %v1563_v0, %v930_v44  ;;  %vm937_vm9 = vweird.f32 %v1563_v0 }
0x10ce   :  { %vm938_vm11 = vmor %vm936_vm10, %vm937_vm9 }
0x10cf   :  { %v933_v4 = vsub.f32 1.0, %v932_v1 }
0x10d1   :  { %v934_v5 = vmul.f32 %v1563_v0, %v933_v4 }
0x10d3   :  { %v935_v6 = vadd.f32 %v1563_v0, %v934_v5 }
0x10d5   :  { %v939_v9 = vsel %vm938_vm11, %v1563_v0, %v935_v6 }
0x10d6   :  { %v944_v12 = vsel %vm941_vm12, %v943_v10, %v939_v9  ;;  %v1384_v10 = vld [vmem:[%s1942_s0 + $0x38] sm:$0xff] }
0x10d7   :  { %v947_v14 = vmul.f32 %v944_v12, %v1839_v29 }
0x1134   :  { %v950_v11 = vpop.permute.xlu1 %949 }
0x1135   :  { %v952_v13 = vmul.f32 %v950_v11, %v944_v12 }
0x1137   :  { %954 = vrot.lane.b32.xlu2 %v952_v13, %s1616_s8  ;;  %v642_v13 = vadd.f32 %v1384_v10, %v1865_v54 }
0x1139   :  { %v1394_v22 = vmul.f32 -1.442695, %v642_v13 }
0x1191   :  { %v955_v15 = vpop.permute.xlu2 %954 }
0x1192   :  { %v957_v16 = vadd.f32 %v955_v15, %v947_v14 }
0x1194   :  { %1564 = vtanh.f32 %v957_v16 }
0x119a   :  { %v1565_v17 = vpop.eup %1564 }
0x119b   :  { %960 = vrot.lane.b32.xlu0 %v1565_v17, %s1615_s30 }
0x120d   :  { %v961_v18 = vpop.permute.xlu0 %960 }
0x120e   :  { %v963_v19 = vmul.f32 %v961_v18, %v944_v12 }
0x1210   :  { %v966_v20 = vpack.c.bf16 %v963_v19, %v963_v19 }
0x1212   :  { %968 = vrot.lane.b32.xlu1 %v966_v20, %s1616_s8 }
0x1284   :  { %v969_v21 = vpop.permute.xlu1 %968 }
0x1285   :  { %1436 = vmatmul.msk.bf16.vlgmr.msrb.gmra.mxu1 %vm44_vm4, %v969_v21 }
0x1302   :  { %v982_v24 = vpop.f32.mrf.mxu1 }
0x1303   :  { %v986_v25 = vadd.f32 %v982_v24, %v756_v23 }
0x1305   :  { %1566 = vtanh.f32 %v986_v25  ;;  %v1437_v30 = vmul.f32 -1.442695, %v986_v25 }
0x1307   :  { %1568 = vpow2.f32 %v1437_v30 }
0x130a   :  { %v984_v26 = vpop.f32.mrf.mxu1 }
0x130b   :  { %v1567_v27 = vpop.eup %1566 }
0x130c   :  { %1009 = vrot.lane.b32.xlu2 %v1567_v27, %s1615_s30 }
0x130d   :  { %v1569_v32 = vpop.eup %1568 }
0x130e   :  { %v990_v31 = vadd.f32 1.0, %v1569_v32 }
0x1310   :  { %1570 = vrcp.f32 %v990_v31  ;;  %v1002_v34 = vand.u32 2147483648, %v990_v31  ;;  %vm996_vm14 = vweird.f32 %v990_v31  ;;  %v1000_v41 = vand.u32 2147483647, %v990_v31 }
0x1312   :  { %v1003_v28 = vor.u32 1.1754944e-38, %v1002_v34  ;;  %vm1001_vm0 = vcmp.eq.f32.partialorder %v1000_v41, 8.507059e+37 }
0x1314   :  { %433 = vrot.lane.b32.xlu2 %v1758_v38, %s1616_s8 }
0x1316   :  { %v1571_v36 = vpop.eup %1570 }
0x1317   :  { %v992_v63 = vmul.f32 %v1571_v36, %v990_v31  ;;  %vm997_vm13 = vweird.f32 %v1571_v36 }
0x1318   :  { %vm998_vm15 = vmor %vm996_vm14, %vm997_vm13 }
0x1319   :  { %v993_v37 = vsub.f32 1.0, %v992_v63 }
0x131b   :  { %v994_v29 = vmul.f32 %v1571_v36, %v993_v37 }
0x131d   :  { %v995_v40 = vadd.f32 %v1571_v36, %v994_v29 }
0x131f   :  { %v999_v42 = vsel %vm998_vm15, %v1571_v36, %v995_v40 }
0x1320   :  { %v1004_v38 = vsel %vm1001_vm0, %v1003_v28, %v999_v42 }
0x1321   :  { %v1007_v3 = vmul.f32 %v1004_v38, %v957_v16 }
0x1366   :  { %v1010_v45 = vpop.permute.xlu2 %1009 }
0x1367   :  { %v1012_v46 = vmul.f32 %v1010_v45, %v1004_v38 }
0x1369   :  { %1014 = vrot.lane.b32.xlu0 %v1012_v46, %s1616_s8 }
0x136e   :  { %v434_v47 = vpop.permute.xlu2 %433 }
0x136f   :  { %437 = vst.msk [vmem:[#allocation3 + $0x10] sm:$0xf] %vm104_vm6, %v434_v47 }
0x1371   :  { %516 = vrot.lane.b32.xlu0 %v1807_v39, %s1616_s8 }
0x13db   :  { %v1015_v48 = vpop.permute.xlu0 %1014 }
0x13dc   :  { %v1017_v49 = vadd.f32 %v1015_v48, %v1007_v3 }
0x13de   :  { %1572 = vtanh.f32 %v1017_v49 }
0x13e3   :  { %v517_v50 = vpop.permute.xlu0 %516 }
0x13e4   :  { %v1573_v2 = vpop.eup %1572  ;;  %520 = vst.msk [vmem:[#allocation3 + $0x14] sm:$0xf] %vm104_vm6, %v517_v50 }
0x13e5   :  { %1020 = vrot.lane.b32.xlu1 %v1573_v2, %s1615_s30 }
0x13eb   :  { %v1473_v52 = vld [vmem:[#allocation3 + $0x10] sm:$0xff] }
0x13ec   :  { %1421 = vmatmul.msk.bf16.gmra.mxu0 %vm44_vm4, %v1473_v52 }
0x1457   :  { %v1021_v53 = vpop.permute.xlu1 %1020 }
0x1458   :  { %v1023_v55 = vmul.f32 %v1021_v53, %v1004_v38 }
0x145a   :  { %v1026_v56 = vpack.c.bf16 %v1023_v55, %v1023_v55 }
0x145c   :  { %1028 = vrot.lane.b32.xlu1 %v1026_v56, %s1616_s8 }
0x1469   :  { %v758_v39 = vpop.f32.mrf.mxu0 }
0x146a   :  { %v759_v58 = vadd.f32 %v1789_v51, %v758_v39 }
0x1471   :  { %v760_v45 = vpop.f32.mrf.mxu0 }
0x1472   :  { %v761_v38 = vadd.f32 %v1789_v51, %v760_v45 }
0x14ce   :  { %v1029_v57 = vpop.permute.xlu1 %1028 }
0x14cf   :  { %1438 = vmatmul.msk.bf16.vlgmr.msrb.gmra.mxu2 %vm44_vm4, %v1029_v57 }
0x1552   :  { %v1042_v59 = vpop.f32.mrf.mxu2 }
0x1553   :  { %v1046_v60 = vadd.f32 %v1042_v59, %v759_v58 }
0x1555   :  { %1574 = vtanh.f32 %v1046_v60  ;;  %v1439_v43 = vmul.f32 -1.442695, %v1046_v60 }
0x1557   :  { %1576 = vpow2.f32 %v1439_v43 }
0x155a   :  { %v1044_v61 = vpop.f32.mrf.mxu2 }
0x155b   :  { %v1575_v62 = vpop.eup %1574 }
0x155c   :  { %1069 = vrot.lane.b32.xlu2 %v1575_v62, %s1615_s30 }
0x155d   :  { %v1577_v44 = vpop.eup %1576 }
0x155e   :  { %v1050_v0 = vadd.f32 1.0, %v1577_v44 }
0x1560   :  { %1578 = vrcp.f32 %v1050_v0  ;;  %v1062_v8 = vand.u32 2147483648, %v1050_v0  ;;  %vm1056_vm2 = vweird.f32 %v1050_v0  ;;  %v1060_v9 = vand.u32 2147483647, %v1050_v0 }
0x1561   :  { %1580 = vtanh.f32 %v642_v13 }
0x1562   :  { %v1063_v12 = vor.u32 1.1754944e-38, %v1062_v8  ;;  %vm1061_vm5 = vcmp.eq.f32.partialorder %v1060_v9, 8.507059e+37 }
0x1566   :  { %v1579_v1 = vpop.eup %1578 }
0x1567   :  { %v1052_v4 = vmul.f32 %v1579_v1, %v1050_v0  ;;  %vm1057_vm1 = vweird.f32 %v1579_v1  ;;  %v1581_v17 = vpop.eup %1580 }
0x1568   :  { %vm1058_vm3 = vmor %vm1056_vm2, %vm1057_vm1 }
0x1569   :  { %v1053_v5 = vsub.f32 1.0, %v1052_v4 }
0x156b   :  { %v1054_v6 = vmul.f32 %v1579_v1, %v1053_v5 }
0x156d   :  { %v1055_v7 = vadd.f32 %v1579_v1, %v1054_v6 }
0x156f   :  { %v1059_v11 = vsel %vm1058_vm3, %v1579_v1, %v1055_v7 }
0x1570   :  { %v1064_v15 = vsel %vm1061_vm5, %v1063_v12, %v1059_v11 }
0x1571   :  { %v1067_v18 = vmul.f32 %v1064_v15, %v1017_v49 }
0x15b6   :  { %v1070_v14 = vpop.permute.xlu2 %1069 }
0x15b7   :  { %v1072_v16 = vmul.f32 %v1070_v14, %v1064_v15 }
0x15b9   :  { %1074 = vrot.lane.b32.xlu0 %v1072_v16, %s1616_s8 }
0x15c1   :  { %665 = vrot.lane.b32.xlu0 %v1581_v17, %s1615_s30 }
0x162b   :  { %v1075_v19 = vpop.permute.xlu0 %1074 }
0x162c   :  { %v1895_v20 = vadd.f32 %v1075_v19, %v1067_v18 }
0x162e   :  { %1582 = vtanh.f32 %v1895_v20 }
0x162f   :  { %1584 = vpow2.f32 %v1394_v22 }
0x1633   :  { %v666_v34 = vpop.permute.xlu0 %665 }
0x1634   :  { %v1583_v21 = vpop.eup %1582 }
0x1635   :  { %1080 = vrot.lane.b32.xlu1 %v1583_v21, %s1615_s30  ;;  %v1585_v54 = vpop.eup %1584 }
0x1636   :  { %v646_v23 = vadd.f32 1.0, %v1585_v54 }
0x1638   :  { %1586 = vrcp.f32 %v646_v23  ;;  %v658_v63 = vand.u32 2147483648, %v646_v23  ;;  %vm652_vm8 = vweird.f32 %v646_v23  ;;  %v656_v37 = vand.u32 2147483647, %v646_v23 }
0x163a   :  { %v659_v40 = vor.u32 1.1754944e-38, %v658_v63  ;;  %vm657_vm10 = vcmp.eq.f32.partialorder %v656_v37, 8.507059e+37 }
0x163e   :  { %v1587_v24 = vpop.eup %1586 }
0x163f   :  { %v648_v25 = vmul.f32 %v1587_v24, %v646_v23  ;;  %vm653_vm7 = vweird.f32 %v1587_v24 }
0x1640   :  { %vm654_vm9 = vmor %vm652_vm8, %vm653_vm7 }
0x1641   :  { %v649_v26 = vsub.f32 1.0, %v648_v25 }
0x1643   :  { %v650_v27 = vmul.f32 %v1587_v24, %v649_v26 }
0x1645   :  { %v651_v31 = vadd.f32 %v1587_v24, %v650_v27 }
0x1647   :  { %v655_v29 = vsel %vm654_vm9, %v1587_v24, %v651_v31 }
0x1648   :  { %v660_v41 = vsel %vm657_vm10, %v659_v40, %v655_v29 }
0x1649   :  { %v668_v42 = vmul.f32 %v666_v34, %v660_v41  ;;  %v663_v48 = vmul.f32 %v660_v41, %v1832_v35 }
0x16a7   :  { %v1081_v30 = vpop.permute.xlu1 %1080 }
0x16a8   :  { %v1083_v32 = vmul.f32 %v1081_v30, %v1064_v15 }
0x16aa   :  { %v1086_v36 = vpack.c.bf16 %v1083_v32, %v1083_v32 }
0x16ac   :  { %1088 = vrot.lane.b32.xlu2 %v1086_v36, %s1616_s8 }
0x16b4   :  { %670 = vrot.lane.b32.xlu2 %v668_v42, %s1616_s8 }
0x1706   :  { %v1089_v28 = vpop.permute.xlu2 %1088 }
0x1707   :  { %1440 = vmatmul.msk.bf16.vlgmr.msrb.gmra.mxu3 %vm44_vm4, %v1089_v28 }
0x170e   :  { %v671_v3 = vpop.permute.xlu2 %670 }
0x170f   :  { %v673_v49 = vadd.f32 %v671_v3, %v663_v48 }
0x178a   :  { %v1102_v46 = vpop.f32.mrf.mxu3 }
0x178b   :  { %v1106_v47 = vadd.f32 %v1102_v46, %v761_v38 }
0x178d   :  { %1588 = vtanh.f32 %v1106_v47  ;;  %v1441_v53 = vmul.f32 -1.442695, %v1106_v47 }
0x178e   :  { %1590 = vtanh.f32 %v673_v49 }
0x178f   :  { %1592 = vpow2.f32 %v1441_v53 }
0x1792   :  { %v1104_v50 = vpop.f32.mrf.mxu3 }
0x1793   :  { %v1589_v2 = vpop.eup %1588 }
0x1794   :  { %1129 = vrot.lane.b32.xlu1 %v1589_v2, %s1615_s30  ;;  %v1591_v52 = vpop.eup %1590 }
0x1795   :  { %v1593_v55 = vpop.eup %1592 }
0x1796   :  { %v1110_v56 = vadd.f32 1.0, %v1593_v55 }
0x1798   :  { %1594 = vrcp.f32 %v1110_v56  ;;  %v1122_v35 = vand.u32 2147483648, %v1110_v56  ;;  %vm1116_vm12 = vweird.f32 %v1110_v56  ;;  %v1120_v61 = vand.u32 2147483647, %v1110_v56 }
0x179a   :  { %v1123_v43 = vor.u32 1.1754944e-38, %v1122_v35  ;;  %vm1121_vm14 = vcmp.eq.f32.partialorder %v1120_v61, 8.507059e+37 }
0x179c   :  { %676 = vrot.lane.b32.xlu1 %v1591_v52, %s1615_s30 }
0x179e   :  { %v1595_v57 = vpop.eup %1594 }
0x179f   :  { %v1112_v39 = vmul.f32 %v1595_v57, %v1110_v56  ;;  %vm1117_vm11 = vweird.f32 %v1595_v57 }
0x17a0   :  { %vm1118_vm13 = vmor %vm1116_vm12, %vm1117_vm11 }
0x17a1   :  { %v1113_v58 = vsub.f32 1.0, %v1112_v39 }
0x17a3   :  { %v1114_v59 = vmul.f32 %v1595_v57, %v1113_v58 }
0x17a5   :  { %v1115_v60 = vadd.f32 %v1595_v57, %v1114_v59 }
0x17a7   :  { %v1119_v62 = vsel %vm1118_vm13, %v1595_v57, %v1115_v60 }
0x17a8   :  { %v1124_v0 = vsel %vm1121_vm14, %v1123_v43, %v1119_v62 }
0x17a9   :  { %v1127_v7 = vmul.f32 %v1124_v0, %v1895_v20 }
0x1806   :  { %v1130_v44 = vpop.permute.xlu1 %1129 }
0x1807   :  { %v1132_v1 = vmul.f32 %v1130_v44, %v1124_v0 }
0x1809   :  { %1134 = vrot.lane.b32.xlu0 %v1132_v1, %s1616_s8 }
0x180e   :  { %v677_v4 = vpop.permute.xlu1 %676 }
0x180f   :  { %v679_v5 = vmul.f32 %v677_v4, %v660_v41 }
0x1811   :  { %v680_v6 = vpack.c.bf16 %v679_v5, %v679_v5  ;;  %599 = vrot.lane.b32.xlu0 %v1848_v33, %s1616_s8 }
0x1813   :  { %682 = vrot.lane.b32.xlu1 %v680_v6, %s1616_s8 }
0x187b   :  { %v1135_v8 = vpop.permute.xlu0 %1134 }
0x187c   :  { %v1137_v9 = vadd.f32 %v1135_v8, %v1127_v7  ;;  %v1480_v8 = vld [vmem:[%s1946_s5 + $0x8] sm:$0xff] }
0x187d   :  { %1297 = vmatpush.bf16.msra.mxu3 %v1480_v8 }
0x187e   :  { %1596 = vtanh.f32 %v1137_v9 }
0x1883   :  { %v600_v10 = vpop.permute.xlu0 %599 }
0x1884   :  { %v1597_v11 = vpop.eup %1596  ;;  %603 = vst.msk [vmem:[#allocation3 + $0x18] sm:$0xf] %vm104_vm6, %v600_v10 }
0x1885   :  { %1140 = vrot.lane.b32.xlu2 %v1597_v11, %s1615_s30  ;;  %v683_v12 = vpop.permute.xlu1 %682 }
0x1886   :  { %686 = vst.msk [vmem:[#allocation3 + $0x1c] sm:$0xf] %vm104_vm6, %v683_v12 }
0x188d   :  { %v1474_v13 = vld [vmem:[#allocation3 + $0x18] sm:$0xff] }
0x188e   :  { %1422 = vmatmul.msk.bf16.gmra.mxu0 %vm44_vm4, %v1474_v13 }
0x18df   :  { %v1141_v33 = vpop.permute.xlu2 %1140 }
0x18e0   :  { %v1143_v14 = vmul.f32 %v1141_v33, %v1124_v0  ;;  %v1485_v33 = vld [vmem:[%s1947_s6] ss:$0 sm:$0xff] }
0x18e2   :  { %v1146_v15 = vpack.c.bf16 %v1143_v14, %v1143_v14 }
0x18e4   :  { %1148 = vrot.lane.b32.xlu2 %v1146_v15, %s1616_s8 }
0x190b   :  { %v763_v17 = vpop.f32.mrf.mxu0 }
0x190c   :  { %v764_v18 = vadd.f32 %v1789_v51, %v763_v17 }
0x1913   :  { %v765_v48 = vpop.f32.mrf.mxu0 }
0x1914   :  { %v766_v49 = vadd.f32 %v1789_v51, %v765_v48 }
0x193e   :  { %v1149_v16 = vpop.permute.xlu2 %1148 }
0x193f   :  { %1442 = vmatmul.msk.bf16.vlgmr.msra.gmra.mxu1 %vm44_vm4, %v1149_v16 }
0x19bc   :  { %v1162_v19 = vpop.f32.mrf.mxu1 }
0x19bd   :  { %v1166_v20 = vadd.f32 %v1162_v19, %v764_v18 }
0x19bf   :  { %1598 = vtanh.f32 %v1166_v20  ;;  %v1443_v54 = vmul.f32 -1.442695, %v1166_v20 }
0x19c1   :  { %1600 = vpow2.f32 %v1443_v54 }
0x19c4   :  { %v1164_v21 = vpop.f32.mrf.mxu1 }
0x19c5   :  { %v1599_v22 = vpop.eup %1598 }
0x19c6   :  { %1189 = vrot.lane.b32.xlu0 %v1599_v22, %s1615_s30 }
0x19c7   :  { %v1601_v23 = vpop.eup %1600 }
0x19c8   :  { %v1170_v24 = vadd.f32 1.0, %v1601_v23 }
0x19ca   :  { %1602 = vrcp.f32 %v1170_v24  ;;  %v1182_v31 = vand.u32 2147483648, %v1170_v24  ;;  %vm1176_vm15 = vweird.f32 %v1170_v24  ;;  %v1180_v36 = vand.u32 2147483647, %v1170_v24 }
0x19cc   :  { %v1183_v37 = vor.u32 1.1754944e-38, %v1182_v31  ;;  %vm1181_vm1 = vcmp.eq.f32.partialorder %v1180_v36, 8.507059e+37 }
0x19d0   :  { %v1603_v25 = vpop.eup %1602 }
0x19d1   :  { %v1172_v26 = vmul.f32 %v1603_v25, %v1170_v24  ;;  %vm1177_vm6 = vweird.f32 %v1603_v25 }
0x19d2   :  { %vm1178_vm0 = vmor %vm1176_vm15, %vm1177_vm6 }
0x19d3   :  { %v1173_v27 = vsub.f32 1.0, %v1172_v26 }
0x19d5   :  { %v1174_v30 = vmul.f32 %v1603_v25, %v1173_v27 }
0x19d7   :  { %v1175_v32 = vadd.f32 %v1603_v25, %v1174_v30 }
0x19d9   :  { %v1179_v63 = vsel %vm1178_vm0, %v1603_v25, %v1175_v32 }
0x19da   :  { %v1184_v40 = vsel %vm1181_vm1, %v1183_v37, %v1179_v63 }
0x19db   :  { %v1187_v41 = vmul.f32 %v1184_v40, %v1137_v9  ;;  %v1479_v9 = vld [vmem:[%s1946_s5] sm:$0xff] }
0x19dc   :  { %1298 = vmatpush.bf16.msra.mxu3 %v1479_v9 }
0x1a38   :  { %v1190_v29 = vpop.permute.xlu0 %1189 }
0x1a39   :  { %v1192_v34 = vmul.f32 %v1190_v29, %v1184_v40 }
0x1a3b   :  { %1194 = vrot.lane.b32.xlu1 %v1192_v34, %s1616_s8 }
0x1aad   :  { %v1195_v42 = vpop.permute.xlu1 %1194 }
0x1aae   :  { %v1197_v28 = vadd.f32 %v1195_v42, %v1187_v41 }
0x1ab0   :  { %1604 = vtanh.f32 %v1197_v28 }
0x1ab6   :  { %v1605_v45 = vpop.eup %1604 }
0x1ab7   :  { %1200 = vrot.lane.b32.xlu2 %v1605_v45, %s1615_s30 }
0x1b11   :  { %v1201_v38 = vpop.permute.xlu2 %1200 }
0x1b12   :  { %v1203_v46 = vmul.f32 %v1201_v38, %v1184_v40 }
0x1b14   :  { %v1206_v47 = vpack.c.bf16 %v1203_v46, %v1203_v46 }
0x1b16   :  { %1208 = vrot.lane.b32.xlu0 %v1206_v47, %s1616_s8 }
0x1b88   :  { %v1209_v3 = vpop.permute.xlu0 %1208 }
0x1b89   :  { %1444 = vmatmul.msk.bf16.vlgmr.msra.gmra.mxu2 %vm44_vm4, %v1209_v3 }
0x1c0c   :  { %v1222_v50 = vpop.f32.mrf.mxu2 }
0x1c0d   :  { %v1226_v2 = vadd.f32 %v1222_v50, %v766_v49 }
0x1c0f   :  { %1606 = vtanh.f32 %v1226_v2  ;;  %v1445_v55 = vmul.f32 -1.442695, %v1226_v2 }
0x1c11   :  { %1608 = vpow2.f32 %v1445_v55 }
0x1c14   :  { %v1224_v52 = vpop.f32.mrf.mxu2 }
0x1c15   :  { %v1607_v53 = vpop.eup %1606 }
0x1c16   :  { %1249 = vrot.lane.b32.xlu1 %v1607_v53, %s1615_s30 }
0x1c17   :  { %v1609_v56 = vpop.eup %1608 }
0x1c18   :  { %v1230_v57 = vadd.f32 1.0, %v1609_v56 }
0x1c1a   :  { %1610 = vrcp.f32 %v1230_v57  ;;  %v1242_v61 = vand.u32 2147483648, %v1230_v57  ;;  %vm1236_vm3 = vweird.f32 %v1230_v57  ;;  %v1240_v51 = vand.u32 2147483647, %v1230_v57 }
0x1c1c   :  { %v1243_v43 = vor.u32 1.1754944e-38, %v1242_v61  ;;  %vm1241_vm7 = vcmp.eq.f32.partialorder %v1240_v51, 8.507059e+37 }
0x1c20   :  { %v1611_v39 = vpop.eup %1610 }
0x1c21   :  { %v1232_v58 = vmul.f32 %v1611_v39, %v1230_v57  ;;  %vm1237_vm2 = vweird.f32 %v1611_v39 }
0x1c22   :  { %vm1238_vm5 = vmor %vm1236_vm3, %vm1237_vm2 }
0x1c23   :  { %v1233_v59 = vsub.f32 1.0, %v1232_v58 }
0x1c25   :  { %v1234_v60 = vmul.f32 %v1611_v39, %v1233_v59 }
0x1c27   :  { %v1235_v35 = vadd.f32 %v1611_v39, %v1234_v60 }
0x1c29   :  { %v1239_v62 = vsel %vm1238_vm5, %v1611_v39, %v1235_v35 }
0x1c2a   :  { %v1244_v0 = vsel %vm1241_vm7, %v1243_v43, %v1239_v62 }
0x1c2b   :  { %v1247_v4 = vmul.f32 %v1244_v0, %v1197_v28 }
0x1c88   :  { %v1250_v44 = vpop.permute.xlu1 %1249 }
0x1c89   :  { %v1252_v1 = vmul.f32 %v1250_v44, %v1244_v0 }
0x1c8b   :  { %1254 = vrot.lane.b32.xlu2 %v1252_v1, %s1616_s8 }
0x1ce5   :  { %v1255_v5 = vpop.permute.xlu2 %1254 }
0x1ce6   :  { %v1257_v6 = vadd.f32 %v1255_v5, %v1247_v4 }
0x1ce8   :  { %1612 = vtanh.f32 %v1257_v6 }
0x1cee   :  { %v1613_v7 = vpop.eup %1612 }
0x1cef   :  { %1260 = vrot.lane.b32.xlu0 %v1613_v7, %s1615_s30 }
0x1d61   :  { %v1261_v10 = vpop.permute.xlu0 %1260 }
0x1d62   :  { %v1263_v11 = vmul.f32 %v1261_v10, %v1244_v0 }
0x1d64   :  { %v1264_v12 = vpack.c.bf16 %v1263_v11, %v1263_v11 }
0x1d66   :  { %1274 = vrot.lane.b32.xlu1 %v1264_v12, %s1616_s8 }
0x1dd8   :  { %v1275_v13 = vpop.permute.xlu1 %1274 }
0x1dd9   :  { %1454 = vmatmul.msk.bf16.vlgmr.msra.gmra.mxu3 %vm44_vm4, %v1275_v13 }
0x1e5c   :  { %v1300_v14 = vpop.f32.mrf.mxu3 }
0x1e5d   :  { %v1301_v15 = vadd.f32 %v1485_v33, %v1300_v14 }
0x1e5f   :  { %1304 = vst [vmem:[%s1948_s7] sm:$0xff] %v1301_v15 }
0x1e64   :  { %v1302_v16 = vpop.f32.mrf.mxu3 }

</bundles_post_ra>
